<compile_context>
chip_gen: v7x
topology: tpu7x:2x2x1
jax: 0.10.0
libtpu: 0.0.40
codegen_flags: <defaults>
</compile_context>

<pallas_src>
import functools

import jax
import jax.numpy as jnp
from jax.experimental import pallas as pl
from jax.experimental.pallas import tpu as pltpu

EMB_DIM = 64                      # self.embedding_dim
HIDDEN = (256, 256, EMB_DIM)      # self.dnn_hidden_size
PROPOSAL_NUM = 20                 # self.proposal_num


# ----------------------------------------------------------------------------
# Kernel
# ----------------------------------------------------------------------------
def _causerec_fwd_kernel(x_ref, w_ref, b_ref, o_ref):
    # x_ref: (tb, P*D) lane-dense flattened proposals tile.
    # w_ref: (P*D, D_out) pool-folded collapsed weight (resident).
    # b_ref: (1, D_out)   collapsed bias (resident).
    h = jnp.dot(x_ref[...], w_ref[...], preferred_element_type=jnp.float32)
    o_ref[...] = jnp.tanh(h + b_ref[...]).astype(o_ref.dtype)


# ----------------------------------------------------------------------------
# One-time parameter collapse (NOT in the per-call hot path)
# ----------------------------------------------------------------------------
def collapse_params(w1, b1, w2, b2, w3, b3, proposal_num=PROPOSAL_NUM):
    """Collapse fc1->fc2->fc3 (no inter-layer activation) and fold the
    mean-pool over `proposal_num` proposals into the matmul K dimension.

    Weights are stored (in_features, out_features), i.e. transposed vs torch.
    Exact up to f32 re-association rounding.
    """
    w_eff = w1 @ w2 @ w3                                   # (D, D_out)
    b_eff = ((b1 @ w2) + b2) @ w3 + b3                     # (D_out,)
    w_big = (jnp.tile(w_eff, (proposal_num, 1))
             * (1.0 / proposal_num)).astype(jnp.float32)   # (P*D, D_out)
    return w_big, b_eff.reshape(1, -1).astype(jnp.float32)


# ----------------------------------------------------------------------------
# Generation-aware batch-tile selection
# ----------------------------------------------------------------------------
def _device_info():
    """Return (has_two_tensorcores, scoped_vmem_budget_bytes), robustly."""
    two_tc = False
    vmem_budget = 32 * 1024 * 1024            # v6e / v7x default scoped VMEM
    try:
        kind = jax.devices()[0].device_kind.lower()
        if "v7" in kind:
            two_tc = True                      # 2 TensorCores per chip
        if "v5e" in kind or "v5 lite" in kind or "v5litepod" in kind:
            vmem_budget = 16 * 1024 * 1024     # v5e default scoped VMEM
    except Exception:
        pass
    return two_tc, vmem_budget


def _choose_tile(B, K, dout, block_b):
    """Batch tile: multiple of 8, VMEM-budgeted, >=2 programs only on v7x."""
    if B <= 8:
        return B                               # single tiny block == full batch
    two_tc, vmem_budget = _device_info()
    bytes_per_row = 2 * (K + dout) * 4         # double-buffered in + out, f32
    resident = 2 * (K * dout + dout) * 4       # W_big + bias (both buffers)
    budget = int(vmem_budget * 0.75) - resident
    vmem_cap = max(8, budget // bytes_per_row)
    tb = min(block_b, B, vmem_cap)
    if two_tc:
        # Ensure >=2 grid programs so ("parallel",) shards across both TCs.
        half = (((B + 1) // 2) + 7) // 8 * 8
        tb = min(tb, half)
    return max(8, (tb // 8) * 8)


# ----------------------------------------------------------------------------
# Forward wrapper
# ----------------------------------------------------------------------------
@functools.partial(jax.jit, static_argnames=("tb",))
def _forward_impl(x_flat, w_big, b_eff, *, tb):
    B, K = x_flat.shape
    dout = w_big.shape[1]
    grid = (pl.cdiv(B, tb),)
    return pl.pallas_call(
        _causerec_fwd_kernel,
        out_shape=jax.ShapeDtypeStruct((B, dout), x_flat.dtype),
        grid_spec=pl.GridSpec(
            grid=grid,
            in_specs=[
                pl.BlockSpec((tb, K), lambda i: (i, 0)),     # proposals tile
                pl.BlockSpec((K, dout), lambda i: (0, 0)),   # W_big (resident)
                pl.BlockSpec((1, dout), lambda i: (0, 0)),   # b_eff (resident)
            ],
            out_specs=pl.BlockSpec((tb, dout), lambda i: (i, 0)),
        ),
        compiler_params=pltpu.CompilerParams(
            dimension_semantics=("parallel",)),
    )(x_flat, w_big, b_eff)


def causerec_forward(watch_proposals, w_big, b_eff, *, block_b=1024):
    """watch_proposals: (B, P, D) f32; returns user_embedding (B, D)."""
    B, P, D = watch_proposals.shape
    x_flat = watch_proposals.reshape(B, P * D)   # contiguous, free
    tb = _choose_tile(B, P * D, w_big.shape[1], block_b)
    return _forward_impl(x_flat, w_big, b_eff, tb=tb)


# ----------------------------------------------------------------------------
# Synthetic params + pure-JAX reference (mirrors the PyTorch forward exactly)
# ----------------------------------------------------------------------------
def _init_params(key):
    k1, k2, k3, k4, k5, k6 = jax.random.split(key, 6)
    w1 = jax.random.normal(k1, (EMB_DIM, HIDDEN[0]), jnp.float32) * 0.05
    b1 = jax.random.normal(k2, (HIDDEN[0],), jnp.float32) * 0.05
    w2 = jax.random.normal(k3, (HIDDEN[0], HIDDEN[1]), jnp.float32) * 0.05
    b2 = jax.random.normal(k4, (HIDDEN[1],), jnp.float32) * 0.05
    w3 = jax.random.normal(k5, (HIDDEN[1], HIDDEN[2]), jnp.float32) * 0.05
    b3 = jax.random.normal(k6, (HIDDEN[2],), jnp.float32) * 0.05
    return w1, b1, w2, b2, w3, b3


def _reference_forward(x, w1, b1, w2, b2, w3, b3):
    pooled = jnp.mean(x, axis=1)
    h = pooled @ w1 + b1
    h = h @ w2 + b2
    return jnp.tanh(h @ w3 + b3)


if __name__ == "__main__":
    key = jax.random.PRNGKey(0)
    kx, kp = jax.random.split(key)

    # Small-but-tileable shapes consistent with the module's forward:
    # batch=128 users, proposal_num=20 proposals, embedding_dim=64.
    B = 128
    watch_proposals = jax.random.normal(
        kx, (B, PROPOSAL_NUM, EMB_DIM), jnp.float32)
    raw_params = _init_params(kp)

    # One-time, outside the per-call hot path.
    w_big, b_eff = collapse_params(*raw_params)
    w_big = jax.block_until_ready(w_big)

    out = causerec_forward(watch_proposals, w_big, b_eff)
    out = jax.block_until_ready(out)

    ref = _reference_forward(watch_proposals, *raw_params)
    assert out.shape == (B, EMB_DIM)
    # Collapsed-weight / pool-folded path re-associates the f32 matmuls, so
    # tolerance is slightly looser than bitwise but tight in absolute terms.
    assert jnp.allclose(out, ref, atol=1e-4, rtol=1e-4), "mismatch vs reference"

    print("KERNEL_OK")
</pallas_src>

<mosaic_0001>
module attributes {stable_mosaic.version = 11 : i64} {
  func.func @_causerec_fwd_kernel(%arg0: i32, %arg1: memref<128x1280xf32, #tpu.memory_space<vmem>>, %arg2: memref<1280x64xf32, #tpu.memory_space<vmem>>, %arg3: memref<1x64xf32, #tpu.memory_space<vmem>>, %arg4: memref<128x64xf32, #tpu.memory_space<vmem>>) attributes {dimension_semantics = [#tpu.dimension_semantics<parallel>], iteration_bounds = array<i64: 1>, scalar_prefetch = 0 : i64, scratch_operands = 0 : i64, tpu.core_type = #tpu.core_type<tc>, window_params = [{transform_indices = @transform_0, window_bounds = array<i64: 128, 1280>}, {pipeline_mode = #tpu.pipeline_mode<synchronous>, transform_indices = @transform_1, window_bounds = array<i64: 1280, 64>}, {pipeline_mode = #tpu.pipeline_mode<synchronous>, transform_indices = @transform_2, window_bounds = array<i64: 1, 64>}, {transform_indices = @transform_3, window_bounds = array<i64: 128, 64>}]} {
    %c0 = arith.constant 0 : index
    %c0_0 = arith.constant 0 : index
    %0 = vector.load %arg1[%c0, %c0_0] : memref<128x1280xf32, #tpu.memory_space<vmem>>, vector<128x1280xf32>
    %c0_1 = arith.constant 0 : index
    %c0_2 = arith.constant 0 : index
    %1 = vector.load %arg2[%c0_1, %c0_2] : memref<1280x64xf32, #tpu.memory_space<vmem>>, vector<1280x64xf32>
    %cst = arith.constant dense<0.000000e+00> : vector<128x64xf32>
    %2 = tpu.matmul %0, %1, %cst {dimension_numbers = #tpu.dot_dimension_numbers<[1], [0], [0], [1], [0, 0, 1, 1], [], []>} : vector<128x1280xf32>, vector<1280x64xf32>, vector<128x64xf32> -> vector<128x64xf32>
    %c0_3 = arith.constant 0 : index
    %c0_4 = arith.constant 0 : index
    %3 = vector.load %arg3[%c0_3, %c0_4] : memref<1x64xf32, #tpu.memory_space<vmem>>, vector<1x64xf32>
    %4 = vector.broadcast %3 : vector<1x64xf32> to vector<128x64xf32>
    %5 = arith.addf %2, %4 : vector<128x64xf32>
    %6 = math.tanh %5 : vector<128x64xf32>
    %c0_5 = arith.constant 0 : index
    %c0_6 = arith.constant 0 : index
    %7 = vector.load %arg4[%c0_5, %c0_6] : memref<128x64xf32, #tpu.memory_space<vmem>>, vector<128x64xf32>
    tpu.vector_store %arg4[%c0_5, %c0_6], %6 {strides = array<i32>} : memref<128x64xf32, #tpu.memory_space<vmem>>, vector<128x64xf32>,
    return
  }
  func.func @transform_0(%arg0: i32) -> (i32, i32) {
    %c0_i32 = arith.constant 0 : i32
    %c0_i32_0 = arith.constant 0 : i32
    return %arg0, %c0_i32 : i32, i32
  }
  func.func @transform_1(%arg0: i32) -> (i32, i32) {
    %c0_i32 = arith.constant 0 : i32
    %c0_i32_0 = arith.constant 0 : i32
    %c0_i32_1 = arith.constant 0 : i32
    return %c0_i32, %c0_i32_0 : i32, i32
  }
  func.func @transform_2(%arg0: i32) -> (i32, i32) {
    %c0_i32 = arith.constant 0 : i32
    %c0_i32_0 = arith.constant 0 : i32
    %c0_i32_1 = arith.constant 0 : i32
    return %c0_i32, %c0_i32_0 : i32, i32
  }
  func.func @transform_3(%arg0: i32) -> (i32, i32) {
    %c0_i32 = arith.constant 0 : i32
    %c0_i32_0 = arith.constant 0 : i32
    return %arg0, %c0_i32 : i32, i32
  }
}

</mosaic_0001>

<bundles_post_ra>
// kernel: _forward_impl.1
= control target key start
LH: loop header
LB: loop body
LE: loop exit
PB: predicated region body
PF: predicated region fallthrough
CT: control target
= control target key end

     0   :  { %vm1082_vm0 = vcmask 523264   ;;  %s2855_s1 = inlined_call_operand.vmem [shape: f32[1280,64], index: 1, kind: input, shape index: {}]   ;;  %s2856_s0 = inlined_call_operand.vmem [shape: f32[128,1280], index: 0, kind: input, shape index: {}]   ;;  %s2857_s2 = inlined_call_operand.vmem [shape: f32[1,64], index: 2, kind: input, shape index: {}]   ;;  %s2858_s3 = inlined_call_operand.vmem [shape: f32[128,64], index: 3, kind: output, shape index: {}]  }
   0x1   :  { %v190_v0 = vld [vmem:[%s2855_s1 + $0x80] sm:$0xff]  ;;  %v191_v1 = vld [vmem:[%s2855_s1 + $0x88] sm:$0xff]  ;;  %v192_v5 = vld [vmem:[%s2855_s1 + $0x90] sm:$0xff] }
   0x2   :  { %v174_v2 = vld [vmem:[%s2855_s1] sm:$0xff]  ;;  %v1504_v3 = vpack.c.bf16 %v191_v1, %v190_v0  ;;  %v175_v4 = vld [vmem:[%s2855_s1 + $0x8] sm:$0xff]  ;;  %v193_v6 = vld [vmem:[%s2855_s1 + $0x98] sm:$0xff] }
   0x3   :  { %v1506_v7 = vpack.c.bf16 %v175_v4, %v174_v2  ;;  %v1508_v8 = vpack.c.bf16 %v193_v6, %v192_v5  ;;  %v176_v9 = vld [vmem:[%s2855_s1 + $0x10] sm:$0xff]  ;;  %v177_v10 = vld [vmem:[%s2855_s1 + $0x18] sm:$0xff]  ;;  %v194_v11 = vld [vmem:[%s2855_s1 + $0xa0] sm:$0xff] }
   0x4   :  { %1664 = vmatprep.subr.bf16.mxu1 %v1504_v3  ;;  %1505 = vmatprep.subr.bf16.mxu0 %v1504_v3  ;;  %v195_v12 = vld [vmem:[%s2855_s1 + $0xa8] sm:$0xff]  ;;  %v1510_v13 = vpack.c.bf16 %v177_v10, %v176_v9  ;;  %v178_v15 = vld [vmem:[%s2855_s1 + $0x20] sm:$0xff]  ;;  %v196_v17 = vld [vmem:[%s2855_s1 + $0xb0] sm:$0xff] }
   0x5   :  { %1672 = vmatpush3.bf16.msra.mxu1 %v1506_v7  ;;  %1507 = vmatpush3.bf16.msra.mxu0 %v1506_v7  ;;  %v1512_v14 = vpack.c.bf16 %v195_v12, %v194_v11  ;;  %v179_v16 = vld [vmem:[%s2855_s1 + $0x28] sm:$0xff]  ;;  %v197_v18 = vld [vmem:[%s2855_s1 + $0xb8] sm:$0xff]  ;;  %v180_v21 = vld [vmem:[%s2855_s1 + $0x30] sm:$0xff] }
   0x6   :  { %1665 = vmatprep.subr.bf16.mxu1 %v1508_v8  ;;  %1509 = vmatprep.subr.bf16.mxu0 %v1508_v8  ;;  %v1514_v19 = vpack.c.bf16 %v179_v16, %v178_v15  ;;  %v1516_v20 = vpack.c.bf16 %v197_v18, %v196_v17  ;;  %v181_v22 = vld [vmem:[%s2855_s1 + $0x38] sm:$0xff]  ;;  %v198_v23 = vld [vmem:[%s2855_s1 + $0xc0] sm:$0xff]  ;;  %v199_v24 = vld [vmem:[%s2855_s1 + $0xc8] sm:$0xff] }
   0x7   :  { %v95_v25 = vld [vmem:[%s2856_s0 + $0x288] sm:$0xff]  ;;  %v1518_v26 = vpack.c.bf16 %v181_v22, %v180_v21  ;;  %v1520_v28 = vpack.c.bf16 %v199_v24, %v198_v23  ;;  %v182_v29 = vld [vmem:[%s2855_s1 + $0x40] sm:$0xff]  ;;  %v200_v31 = vld [vmem:[%s2855_s1 + $0xd0] sm:$0xff] }
   0x8   :  { %445 = vmatprep.mubr.f32.mxu1 %v95_v25  ;;  %v15_v27 = vld [vmem:[%s2856_s0 + $0x8] sm:$0xff]  ;;  %v201_v32 = vld [vmem:[%s2855_s1 + $0xd8] sm:$0xff]  ;;  %v184_v35 = vld [vmem:[%s2855_s1 + $0x50] sm:$0xff] }
   0x9   :  { %1673 = vmatpush3.bf16.msra.mxu1 %v1510_v13  ;;  %1511 = vmatpush3.bf16.msra.mxu0 %v1510_v13  ;;  %v183_v30 = vld [vmem:[%s2855_s1 + $0x48] sm:$0xff]  ;;  %v1524_v34 = vpack.c.bf16 %v201_v32, %v200_v31  ;;  %v185_v36 = vld [vmem:[%s2855_s1 + $0x58] sm:$0xff]  ;;  %v202_v37 = vld [vmem:[%s2855_s1 + $0xe0] sm:$0xff] }
   0xa   :  { %1666 = vmatprep.subr.bf16.mxu1 %v1512_v14  ;;  %1513 = vmatprep.subr.bf16.mxu0 %v1512_v14  ;;  %v1522_v33 = vpack.c.bf16 %v183_v30, %v182_v29  ;;  %v203_v38 = vld [vmem:[%s2855_s1 + $0xe8] sm:$0xff]  ;;  %v1526_v39 = vpack.c.bf16 %v185_v36, %v184_v35  ;;  %v186_v41 = vld [vmem:[%s2855_s1 + $0x60] sm:$0xff]  ;;  %v204_v43 = vld [vmem:[%s2855_s1 + $0xf0] sm:$0xff] }
   0xb   :  { %405 = vmatprep.mubr.f32.mxu0 %v15_v27  ;;  %v1528_v40 = vpack.c.bf16 %v203_v38, %v202_v37  ;;  %v187_v42 = vld [vmem:[%s2855_s1 + $0x68] sm:$0xff]  ;;  %v205_v44 = vld [vmem:[%s2855_s1 + $0xf8] sm:$0xff]  ;;  %v188_v47 = vld [vmem:[%s2855_s1 + $0x70] sm:$0xff] }
   0xc   :  { %v1530_v45 = vpack.c.bf16 %v187_v42, %v186_v41  ;;  %v1532_v46 = vpack.c.bf16 %v205_v44, %v204_v43  ;;  %v189_v48 = vld [vmem:[%s2855_s1 + $0x78] sm:$0xff]  ;;  %v222_v49 = vld [vmem:[%s2855_s1 + $0x180] sm:$0xff]  ;;  %v223_v50 = vld [vmem:[%s2855_s1 + $0x188] sm:$0xff] }
   0xd   :  { %1674 = vmatpush3.bf16.msra.mxu1 %v1514_v19  ;;  %1515 = vmatpush3.bf16.msra.mxu0 %v1514_v19  ;;  %v254_v51 = vld [vmem:[%s2855_s1 + $0x280] sm:$0xff]  ;;  %v255_v52 = vld [vmem:[%s2855_s1 + $0x288] sm:$0xff]  ;;  %v1534_v53 = vpack.c.bf16 %v189_v48, %v188_v47  ;;  %v1536_v54 = vpack.c.bf16 %v223_v50, %v222_v49  ;;  %v224_v60 = vld [vmem:[%s2855_s1 + $0x190] sm:$0xff] }
   0xe   :  { %1667 = vmatprep.subr.bf16.mxu1 %v1516_v20  ;;  %1517 = vmatprep.subr.bf16.mxu0 %v1516_v20  ;;  %v206_v55 = vld [vmem:[%s2855_s1 + $0x100] sm:$0xff]  ;;  %v207_v56 = vld [vmem:[%s2855_s1 + $0x108] sm:$0xff]  ;;  %v1568_v57 = vpack.c.bf16 %v255_v52, %v254_v51  ;;  %v225_v61 = vld [vmem:[%s2855_s1 + $0x198] sm:$0xff] }
   0xf   :  { %v238_v58 = vld [vmem:[%s2855_s1 + $0x200] sm:$0xff]  ;;  %v239_v59 = vld [vmem:[%s2855_s1 + $0x208] sm:$0xff]  ;;  %v256_v62 = vld [vmem:[%s2855_s1 + $0x290] sm:$0xff]  ;;  %v1538_v1 = vpack.c.bf16 %v207_v56, %v206_v55  ;;  %v1540_v5 = vpack.c.bf16 %v225_v61, %v224_v60 }
  0x10   :  { %v257_v63 = vld [vmem:[%s2855_s1 + $0x298] sm:$0xff]  ;;  %v94_v0 = vld [vmem:[%s2856_s0 + $0x280] sm:$0xff]  ;;  %v1570_v4 = vpack.c.bf16 %v239_v59, %v238_v58  ;;  %v208_v6 = vld [vmem:[%s2855_s1 + $0x110] sm:$0xff] }
  0x11   :  { %1675 = vmatpush3.bf16.msra.mxu1 %v1518_v26  ;;  %1519 = vmatpush3.bf16.msra.mxu0 %v1518_v26  ;;  %v14_v2 = vld [vmem:[%s2856_s0] sm:$0xff]  ;;  %v105_v3 = vld [vmem:[%s2856_s0 + $0x2d8] sm:$0xff]  ;;  %v240_v8 = vld [vmem:[%s2855_s1 + $0x210] sm:$0xff]  ;;  %v1572_v9 = vpack.c.bf16 %v257_v63, %v256_v62 }
  0x12   :  { %1668 = vmatprep.subr.bf16.mxu1 %v1520_v28  ;;  %1521 = vmatprep.subr.bf16.mxu0 %v1520_v28  ;;  %v209_v7 = vld [vmem:[%s2855_s1 + $0x118] sm:$0xff]  ;;  %v226_v11 = vld [vmem:[%s2855_s1 + $0x1a0] sm:$0xff]  ;;  %v227_v12 = vld [vmem:[%s2855_s1 + $0x1a8] sm:$0xff] }
  0x13   :  { %v241_v10 = vld [vmem:[%s2855_s1 + $0x218] sm:$0xff]  ;;  %v258_v14 = vld [vmem:[%s2855_s1 + $0x2a0] sm:$0xff]  ;;  %v259_v15 = vld [vmem:[%s2855_s1 + $0x2a8] sm:$0xff]  ;;  %v1542_v17 = vpack.c.bf16 %v209_v7, %v208_v6  ;;  %v1544_v21 = vpack.c.bf16 %v227_v12, %v226_v11 }
  0x14   :  { %v25_v13 = vld [vmem:[%s2856_s0 + $0x58] sm:$0xff]  ;;  %v104_v16 = vld [vmem:[%s2856_s0 + $0x2d0] sm:$0xff]  ;;  %v115_v19 = vld [vmem:[%s2856_s0 + $0x328] sm:$0xff]  ;;  %v1574_v20 = vpack.c.bf16 %v241_v10, %v240_v8  ;;  %v1576_v25 = vpack.c.bf16 %v259_v15, %v258_v14 }
  0x15   :  { %1676 = vmatpush3.bf16.msra.mxu1 %v1522_v33  ;;  %1523 = vmatpush3.bf16.msra.mxu0 %v1522_v33  ;;  %v24_v18 = vld [vmem:[%s2856_s0 + $0x50] sm:$0xff]  ;;  %v210_v22 = vld [vmem:[%s2855_s1 + $0x120] sm:$0xff]  ;;  %v211_v23 = vld [vmem:[%s2855_s1 + $0x128] sm:$0xff] }
  0x16   :  { %1669 = vmatprep.subr.bf16.mxu1 %v1524_v34  ;;  %1525 = vmatprep.subr.bf16.mxu0 %v1524_v34  ;;  %v242_v24 = vld [vmem:[%s2855_s1 + $0x220] sm:$0xff]  ;;  %v243_v26 = vld [vmem:[%s2855_s1 + $0x228] sm:$0xff]  ;;  %v228_v27 = vld [vmem:[%s2855_s1 + $0x1b0] sm:$0xff]  ;;  %v1546_v33 = vpack.c.bf16 %v211_v23, %v210_v22 }
  0x17   :  { %v229_v28 = vld [vmem:[%s2855_s1 + $0x1b8] sm:$0xff]  ;;  %v35_v29 = vld [vmem:[%s2856_s0 + $0xa8] sm:$0xff]  ;;  %v260_v30 = vld [vmem:[%s2855_s1 + $0x2b0] sm:$0xff]  ;;  %v1578_v36 = vpack.c.bf16 %v243_v26, %v242_v24 }
  0x18   :  { %v261_v31 = vld [vmem:[%s2855_s1 + $0x2b8] sm:$0xff]  ;;  %v114_v32 = vld [vmem:[%s2856_s0 + $0x320] sm:$0xff]  ;;  %v1548_v37 = vpack.c.bf16 %v229_v28, %v228_v27  ;;  %v212_v38 = vld [vmem:[%s2855_s1 + $0x130] sm:$0xff] }
  0x19   :  { %1677 = vmatpush3.bf16.msra.mxu1 %v1526_v39  ;;  %1527 = vmatpush3.bf16.msra.mxu0 %v1526_v39  ;;  %v34_v34 = vld [vmem:[%s2856_s0 + $0xa0] sm:$0xff]  ;;  %v125_v35 = vld [vmem:[%s2856_s0 + $0x378] sm:$0xff]  ;;  %v1580_v41 = vpack.c.bf16 %v261_v31, %v260_v30  ;;  %v231_v44 = vld [vmem:[%s2855_s1 + $0x1c8] sm:$0xff] }
  0x1a   :  { %1670 = vmatprep.subr.bf16.mxu1 %v1528_v40  ;;  %1529 = vmatprep.subr.bf16.mxu0 %v1528_v40  ;;  %v213_v39 = vld [vmem:[%s2855_s1 + $0x138] sm:$0xff]  ;;  %v244_v40 = vld [vmem:[%s2855_s1 + $0x230] sm:$0xff]  ;;  %v230_v43 = vld [vmem:[%s2855_s1 + $0x1c0] sm:$0xff] }
  0x1b   :  { %v245_v42 = vld [vmem:[%s2855_s1 + $0x238] sm:$0xff]  ;;  %v263_v47 = vld [vmem:[%s2855_s1 + $0x2c8] sm:$0xff]  ;;  %v124_v48 = vld [vmem:[%s2856_s0 + $0x370] sm:$0xff]  ;;  %v1550_v49 = vpack.c.bf16 %v213_v39, %v212_v38 }
  0x1c   :  { %v44_v50 = vld [vmem:[%s2856_s0 + $0xf0] sm:$0xff]  ;;  %v135_v51 = vld [vmem:[%s2856_s0 + $0x3c8] sm:$0xff]  ;;  %v1582_v52 = vpack.c.bf16 %v245_v42, %v244_v40  ;;  %v246_v56 = vld [vmem:[%s2855_s1 + $0x240] sm:$0xff] }
  0x1d   :  { %1678 = vmatpush3.bf16.msra.mxu1 %v1530_v45  ;;  %1531 = vmatpush3.bf16.msra.mxu0 %v1530_v45  ;;  %v45_v45 = vld [vmem:[%s2856_s0 + $0xf8] sm:$0xff]  ;;  %v215_v55 = vld [vmem:[%s2855_s1 + $0x148] sm:$0xff]  ;;  %v232_v59 = vld [vmem:[%s2855_s1 + $0x1d0] sm:$0xff] }
  0x1e   :  { %1671 = vmatprep.subr.bf16.mxu1 %v1532_v46  ;;  %1533 = vmatprep.subr.bf16.mxu0 %v1532_v46  ;;  %v262_v46 = vld [vmem:[%s2855_s1 + $0x2c0] sm:$0xff]  ;;  %v247_v58 = vld [vmem:[%s2855_s1 + $0x248] sm:$0xff]  ;;  %v233_v60 = vld [vmem:[%s2855_s1 + $0x1d8] sm:$0xff] }
  0x1f   :  { %v55_v61 = vld [vmem:[%s2856_s0 + $0x148] sm:$0xff]  ;;  %v264_v62 = vld [vmem:[%s2855_s1 + $0x2d0] sm:$0xff]  ;;  %v265_v63 = vld [vmem:[%s2855_s1 + $0x2d8] sm:$0xff] }
  0x20   :  { %v216_v6 = vld [vmem:[%s2855_s1 + $0x150] sm:$0xff]  ;;  %v217_v7 = vld [vmem:[%s2855_s1 + $0x158] sm:$0xff]  ;;  %v234_v11 = vld [vmem:[%s2855_s1 + $0x1e0] sm:$0xff] }
  0x21   :  { %1679 = vmatpush3.bf16.msra.mxu1 %v1534_v53  ;;  %1535 = vmatpush3.bf16.msra.mxu0 %v1534_v53  ;;  %v1552_v53 = vpack.c.bf16 %v231_v44, %v230_v43  ;;  %v248_v8 = vld [vmem:[%s2855_s1 + $0x250] sm:$0xff]  ;;  %v249_v10 = vld [vmem:[%s2855_s1 + $0x258] sm:$0xff]  ;;  %v235_v12 = vld [vmem:[%s2855_s1 + $0x1e8] sm:$0xff] }
  0x22   :  { %1537 = vmatprep.subr.bf16.mxu1 %v1536_v54  ;;  %1569 = vmatprep.subr.bf16.mxu0 %v1568_v57  ;;  %v214_v54 = vld [vmem:[%s2855_s1 + $0x140] sm:$0xff]  ;;  %v1584_v57 = vpack.c.bf16 %v263_v47, %v262_v46  ;;  %v267_v15 = vld [vmem:[%s2855_s1 + $0x2e8] sm:$0xff]  ;;  %v236_v27 = vld [vmem:[%s2855_s1 + $0x1f0] sm:$0xff] }
  0x23   :  { %v266_v14 = vld [vmem:[%s2855_s1 + $0x2e0] sm:$0xff]  ;;  %v219_v23 = vld [vmem:[%s2855_s1 + $0x168] sm:$0xff]  ;;  %v237_v28 = vld [vmem:[%s2855_s1 + $0x1f8] sm:$0xff] }
  0x24   :  { %446 = vmatmul.mubr.f32.vlgmr.msra.gmra.mrb[0].mxu1 %v94_v0  ;;  %406 = vmatmul.mubr.f32.vlgmr.msra.gmra.mrb[0].mxu0 %v14_v2  ;;  %v134_v0 = vld [vmem:[%s2856_s0 + $0x3c0] sm:$0xff]  ;;  %v251_v26 = vld [vmem:[%s2855_s1 + $0x268] sm:$0xff]  ;;  %v268_v30 = vld [vmem:[%s2855_s1 + $0x2f0] sm:$0xff] }
  0x25   :  { %1539 = vmatpush3.bf16.msra.mxu1 %v1538_v1  ;;  %450 = vmatprep.mubr.f32.mxu1 %v105_v3  ;;  %v1554_v1 = vpack.c.bf16 %v215_v55, %v214_v54  ;;  %v54_v2 = vld [vmem:[%s2856_s0 + $0x140] sm:$0xff]  ;;  %v145_v3 = vld [vmem:[%s2856_s0 + $0x418] sm:$0xff]  ;;  %v220_v38 = vld [vmem:[%s2855_s1 + $0x170] sm:$0xff] }
  0x26   :  { %1571 = vmatpush3.bf16.msra.mxu0 %v1570_v4  ;;  %1541 = vmatprep.subr.bf16.mxu1 %v1540_v5  ;;  %v1586_v4 = vpack.c.bf16 %v247_v58, %v246_v56  ;;  %v1556_v5 = vpack.c.bf16 %v233_v60, %v232_v59  ;;  %v218_v22 = vld [vmem:[%s2855_s1 + $0x160] sm:$0xff]  ;;  %v269_v31 = vld [vmem:[%s2855_s1 + $0x2f8] sm:$0xff]  ;;  %v252_v40 = vld [vmem:[%s2855_s1 + $0x270] sm:$0xff] }
  0x27   :  { %410 = vmatprep.mubr.f32.mxu0 %v25_v13  ;;  %1573 = vmatprep.subr.bf16.mxu0 %v1572_v9  ;;  %v1588_v9 = vpack.c.bf16 %v265_v63, %v264_v62  ;;  %v65_v13 = vld [vmem:[%s2856_s0 + $0x198] sm:$0xff]  ;;  %v250_v24 = vld [vmem:[%s2855_s1 + $0x260] sm:$0xff]  ;;  %v287_v44 = vld [vmem:[%s2855_s1 + $0x388] sm:$0xff] }
  0x28   :  { %451 = vmatmul.mubr.f32.gmra.mrb[2].mxu1 %v104_v16  ;;  %411 = vmatmul.mubr.f32.gmra.mrb[2].mxu0 %v24_v18  ;;  %v144_v16 = vld [vmem:[%s2856_s0 + $0x410] sm:$0xff]  ;;  %v221_v39 = vld [vmem:[%s2855_s1 + $0x178] sm:$0xff]  ;;  %v286_v43 = vld [vmem:[%s2855_s1 + $0x380] sm:$0xff] }
  0x29   :  { %1543 = vmatpush3.bf16.msra.mxu1 %v1542_v17  ;;  %455 = vmatprep.mubr.f32.mxu1 %v115_v19  ;;  %v1558_v17 = vpack.c.bf16 %v217_v7, %v216_v6  ;;  %v64_v18 = vld [vmem:[%s2856_s0 + $0x190] sm:$0xff]  ;;  %v155_v19 = vld [vmem:[%s2856_s0 + $0x468] sm:$0xff]  ;;  %v253_v42 = vld [vmem:[%s2855_s1 + $0x278] sm:$0xff] }
  0x2a   :  { %1575 = vmatpush3.bf16.msra.mxu0 %v1574_v20  ;;  %1545 = vmatprep.subr.bf16.mxu1 %v1544_v21  ;;  %v1590_v20 = vpack.c.bf16 %v249_v10, %v248_v8  ;;  %v1560_v21 = vpack.c.bf16 %v235_v12, %v234_v11  ;;  %v318_v46 = vld [vmem:[%s2855_s1 + $0x480] sm:$0xff]  ;;  %v319_v47 = vld [vmem:[%s2855_s1 + $0x488] sm:$0xff]  ;;  %v288_v60 = vld [vmem:[%s2855_s1 + $0x390] sm:$0xff] }
  0x2b   :  { %415 = vmatprep.mubr.f32.mxu0 %v35_v29  ;;  %1577 = vmatprep.subr.bf16.mxu0 %v1576_v25  ;;  %v1592_v25 = vpack.c.bf16 %v267_v15, %v266_v14  ;;  %v75_v29 = vld [vmem:[%s2856_s0 + $0x1e8] sm:$0xff]  ;;  %v270_v54 = vld [vmem:[%s2855_s1 + $0x300] sm:$0xff]  ;;  %v1632_v56 = vpack.c.bf16 %v319_v47, %v318_v46  ;;  %v16_v62 = vld [vmem:[%s2856_s0 + $0x10] sm:$0xff] }
  0x2c   :  { %456 = vmatmul.mubr.f32.gmra.mrb[4].mxu1 %v114_v32  ;;  %416 = vmatmul.mubr.f32.gmra.mrb[4].mxu0 %v34_v34  ;;  %v154_v32 = vld [vmem:[%s2856_s0 + $0x460] sm:$0xff]  ;;  %v271_v55 = vld [vmem:[%s2855_s1 + $0x308] sm:$0xff]  ;;  %v272_v7 = vld [vmem:[%s2855_s1 + $0x310] sm:$0xff] }
  0x2d   :  { %1547 = vmatpush3.bf16.msra.mxu1 %v1546_v33  ;;  %460 = vmatprep.mubr.f32.mxu1 %v125_v35  ;;  %v1562_v33 = vpack.c.bf16 %v219_v23, %v218_v22  ;;  %v74_v34 = vld [vmem:[%s2856_s0 + $0x1e0] sm:$0xff]  ;;  %v165_v35 = vld [vmem:[%s2856_s0 + $0x4b8] sm:$0xff]  ;;  %v303_v58 = vld [vmem:[%s2855_s1 + $0x408] sm:$0xff]  ;;  %v1602_v63 = vpack.c.bf16 %v271_v55, %v270_v54 }
  0x2e   :  { %1579 = vmatpush3.bf16.msra.mxu0 %v1578_v36  ;;  %1549 = vmatprep.subr.bf16.mxu1 %v1548_v37  ;;  %v1594_v36 = vpack.c.bf16 %v251_v26, %v250_v24  ;;  %v1564_v37 = vpack.c.bf16 %v237_v28, %v236_v27  ;;  %v19_v59 = vld [vmem:[%s2856_s0 + $0x28] sm:$0xff]  ;;  %v273_v8 = vld [vmem:[%s2855_s1 + $0x318] sm:$0xff]  ;;  %v290_v12 = vld [vmem:[%s2855_s1 + $0x3a0] sm:$0xff] }
  0x2f   :  { %420 = vmatprep.mubr.f32.mxu0 %v45_v45  ;;  %1581 = vmatprep.subr.bf16.mxu0 %v1580_v41  ;;  %v1596_v41 = vpack.c.bf16 %v269_v31, %v268_v30  ;;  %v85_v45 = vld [vmem:[%s2856_s0 + $0x238] sm:$0xff]  ;;  %v26_v14 = vld [vmem:[%s2856_s0 + $0x60] sm:$0xff]  ;;  %v275_v24 = vld [vmem:[%s2855_s1 + $0x328] sm:$0xff] }
  0x30   :  { %461 = vmatmul.mubr.f32.gmra.mrb[6].mxu1 %v124_v48  ;;  %421 = vmatmul.mubr.f32.gmra.mrb[6].mxu0 %v44_v50  ;;  %v164_v48 = vld [vmem:[%s2856_s0 + $0x4b0] sm:$0xff]  ;;  %v305_v11 = vld [vmem:[%s2855_s1 + $0x418] sm:$0xff]  ;;  %v322_v15 = vld [vmem:[%s2855_s1 + $0x4a0] sm:$0xff] }
  0x31   :  { %1551 = vmatpush3.bf16.msra.mxu1 %v1550_v49  ;;  %465 = vmatprep.mubr.f32.mxu1 %v135_v51  ;;  %v1566_v49 = vpack.c.bf16 %v221_v39, %v220_v38  ;;  %v84_v50 = vld [vmem:[%s2856_s0 + $0x230] sm:$0xff]  ;;  %v17_v51 = vld [vmem:[%s2856_s0 + $0x18] sm:$0xff]  ;;  %v274_v23 = vld [vmem:[%s2855_s1 + $0x320] sm:$0xff] }
  0x32   :  { %1583 = vmatpush3.bf16.msra.mxu0 %v1582_v52  ;;  %1553 = vmatprep.subr.bf16.mxu1 %v1552_v53  ;;  %v1598_v52 = vpack.c.bf16 %v253_v42, %v252_v40  ;;  %v1600_v53 = vpack.c.bf16 %v287_v44, %v286_v43  ;;  %v307_v27 = vld [vmem:[%s2855_s1 + $0x428] sm:$0xff]  ;;  %v292_v28 = vld [vmem:[%s2855_s1 + $0x3b0] sm:$0xff]  ;;  %v277_v40 = vld [vmem:[%s2855_s1 + $0x338] sm:$0xff] }
  0x33   :  { %425 = vmatprep.mubr.f32.mxu0 %v55_v61  ;;  %1585 = vmatprep.subr.bf16.mxu0 %v1584_v57  ;;  %v302_v57 = vld [vmem:[%s2855_s1 + $0x400] sm:$0xff]  ;;  %v289_v61 = vld [vmem:[%s2855_s1 + $0x398] sm:$0xff]  ;;  %v36_v30 = vld [vmem:[%s2856_s0 + $0xb0] sm:$0xff] }
  0x34   :  { %466 = vmatmul.mubr.f32.gmra.mrb[8].mxu1 %v134_v0  ;;  %426 = vmatmul.mubr.f32.gmra.mrb[8].mxu0 %v54_v2  ;;  %v320_v0 = vld [vmem:[%s2855_s1 + $0x490] sm:$0xff]  ;;  %v18_v2 = vld [vmem:[%s2856_s0 + $0x20] sm:$0xff]  ;;  %v1604_v6 = vpack.c.bf16 %v289_v61, %v288_v60  ;;  %v309_v43 = vld [vmem:[%s2855_s1 + $0x438] sm:$0xff] }
  0x35   :  { %1555 = vmatpush3.bf16.msra.mxu1 %v1554_v1  ;;  %470 = vmatprep.mubr.f32.mxu1 %v145_v3  ;;  %v321_v1 = vld [vmem:[%s2855_s1 + $0x498] sm:$0xff]  ;;  %v27_v3 = vld [vmem:[%s2856_s0 + $0x68] sm:$0xff]  ;;  %v324_v31 = vld [vmem:[%s2855_s1 + $0x4b0] sm:$0xff] }
  0x36   :  { %1587 = vmatpush3.bf16.msra.mxu0 %v1586_v4  ;;  %1557 = vmatprep.subr.bf16.mxu1 %v1556_v5  ;;  %v1634_v4 = vpack.c.bf16 %v303_v58, %v302_v57  ;;  %v29_v5 = vld [vmem:[%s2856_s0 + $0x78] sm:$0xff]  ;;  %v1636_v10 = vpack.c.bf16 %v321_v1, %v320_v0  ;;  %v276_v39 = vld [vmem:[%s2855_s1 + $0x330] sm:$0xff]  ;;  %v294_v44 = vld [vmem:[%s2855_s1 + $0x3c0] sm:$0xff] }
  0x37   :  { %430 = vmatprep.mubr.f32.mxu0 %v65_v13  ;;  %1589 = vmatprep.subr.bf16.mxu0 %v1588_v9  ;;  %v304_v9 = vld [vmem:[%s2855_s1 + $0x410] sm:$0xff]  ;;  %v291_v13 = vld [vmem:[%s2855_s1 + $0x3a8] sm:$0xff]  ;;  %v46_v46 = vld [vmem:[%s2856_s0 + $0x100] sm:$0xff] }
  0x38   :  { %471 = vmatmul.mubr.f32.gmra.mrb[10].mxu1 %v144_v16  ;;  %431 = vmatmul.mubr.f32.gmra.mrb[10].mxu0 %v64_v18  ;;  %v323_v16 = vld [vmem:[%s2855_s1 + $0x4a8] sm:$0xff]  ;;  %v37_v18 = vld [vmem:[%s2856_s0 + $0xb8] sm:$0xff]  ;;  %v1608_v22 = vpack.c.bf16 %v291_v13, %v290_v12  ;;  %v326_v47 = vld [vmem:[%s2855_s1 + $0x4c0] sm:$0xff] }
  0x39   :  { %1559 = vmatpush3.bf16.msra.mxu1 %v1558_v17  ;;  %475 = vmatprep.mubr.f32.mxu1 %v155_v19  ;;  %v28_v17 = vld [vmem:[%s2856_s0 + $0x70] sm:$0xff]  ;;  %v39_v19 = vld [vmem:[%s2856_s0 + $0xc8] sm:$0xff]  ;;  %v1640_v26 = vpack.c.bf16 %v323_v16, %v322_v15  ;;  %v278_v55 = vld [vmem:[%s2855_s1 + $0x340] sm:$0xff] }
  0x3a   :  { %1591 = vmatpush3.bf16.msra.mxu0 %v1590_v20  ;;  %1561 = vmatprep.subr.bf16.mxu1 %v1560_v21  ;;  %v1606_v20 = vpack.c.bf16 %v273_v8, %v272_v7  ;;  %v1638_v21 = vpack.c.bf16 %v305_v11, %v304_v9  ;;  %v310_v57 = vld [vmem:[%s2855_s1 + $0x440] sm:$0xff]  ;;  %v296_v60 = vld [vmem:[%s2855_s1 + $0x3d0] sm:$0xff]  ;;  %v297_v61 = vld [vmem:[%s2855_s1 + $0x3d8] sm:$0xff] }
  0x3b   :  { %435 = vmatprep.mubr.f32.mxu0 %v75_v29  ;;  %1593 = vmatprep.subr.bf16.mxu0 %v1592_v25  ;;  %v306_v25 = vld [vmem:[%s2855_s1 + $0x420] sm:$0xff]  ;;  %v293_v29 = vld [vmem:[%s2855_s1 + $0x3b8] sm:$0xff]  ;;  %v280_v7 = vld [vmem:[%s2855_s1 + $0x350] sm:$0xff] }
  0x3c   :  { %476 = vmatmul.mubr.f32.gmra.mrb[12].mxu1 %v154_v32  ;;  %436 = vmatmul.mubr.f32.gmra.mrb[12].mxu0 %v74_v34  ;;  %v325_v32 = vld [vmem:[%s2855_s1 + $0x4b8] sm:$0xff]  ;;  %v47_v34 = vld [vmem:[%s2856_s0 + $0x108] sm:$0xff]  ;;  %v1612_v38 = vpack.c.bf16 %v293_v29, %v292_v28  ;;  %v58_v1 = vld [vmem:[%s2856_s0 + $0x160] sm:$0xff] }
  0x3d   :  { %1563 = vmatpush3.bf16.msra.mxu1 %v1562_v33  ;;  %480 = vmatprep.mubr.f32.mxu1 %v165_v35  ;;  %v38_v33 = vld [vmem:[%s2856_s0 + $0xc0] sm:$0xff]  ;;  %v49_v35 = vld [vmem:[%s2856_s0 + $0x118] sm:$0xff]  ;;  %v1644_v42 = vpack.c.bf16 %v325_v32, %v324_v31  ;;  %v312_v9 = vld [vmem:[%s2855_s1 + $0x450] sm:$0xff] }
  0x3e   :  { %1595 = vmatpush3.bf16.msra.mxu0 %v1594_v36  ;;  %1565 = vmatprep.subr.bf16.mxu1 %v1564_v37  ;;  %v1610_v36 = vpack.c.bf16 %v275_v24, %v274_v23  ;;  %v1642_v37 = vpack.c.bf16 %v307_v27, %v306_v25  ;;  %v329_v0 = vld [vmem:[%s2855_s1 + $0x4d8] sm:$0xff]  ;;  %v298_v12 = vld [vmem:[%s2855_s1 + $0x3e0] sm:$0xff]  ;;  %v299_v13 = vld [vmem:[%s2855_s1 + $0x3e8] sm:$0xff] }
  0x3f   :  { %440 = vmatprep.mubr.f32.mxu0 %v85_v45  ;;  %1597 = vmatprep.subr.bf16.mxu0 %v1596_v41  ;;  %v308_v41 = vld [vmem:[%s2855_s1 + $0x430] sm:$0xff]  ;;  %v295_v45 = vld [vmem:[%s2855_s1 + $0x3c8] sm:$0xff]  ;;  %v281_v8 = vld [vmem:[%s2855_s1 + $0x358] sm:$0xff] }
  0x40   :  { %481 = vmatmul.mubr.f32.gmra.mrb[14].mxu1 %v164_v48  ;;  %441 = vmatmul.mubr.f32.gmra.mrb[14].mxu0 %v84_v50  ;;  %v327_v48 = vld [vmem:[%s2855_s1 + $0x4c8] sm:$0xff]  ;;  %v57_v50 = vld [vmem:[%s2856_s0 + $0x158] sm:$0xff]  ;;  %v1616_v54 = vpack.c.bf16 %v295_v45, %v294_v44  ;;  %v330_v15 = vld [vmem:[%s2855_s1 + $0x4e0] sm:$0xff] }
  0x41   :  { %1567 = vmatpush3.bf16.msra.mxu1 %v1566_v49  ;;  %550 = vmatprep.mubr.f32.mxu1 %v17_v51  ;;  %v48_v49 = vld [vmem:[%s2856_s0 + $0x110] sm:$0xff]  ;;  %v59_v51 = vld [vmem:[%s2856_s0 + $0x168] sm:$0xff]  ;;  %v1648_v58 = vpack.c.bf16 %v327_v48, %v326_v47  ;;  %v313_v11 = vld [vmem:[%s2855_s1 + $0x458] sm:$0xff] }
  0x42   :  { %1599 = vmatpush3.bf16.msra.mxu0 %v1598_v52  ;;  %1601 = vmatprep.subr.bf16.mxu1 %v1600_v53  ;;  %v1614_v52 = vpack.c.bf16 %v277_v40, %v276_v39  ;;  %v1646_v53 = vpack.c.bf16 %v309_v43, %v308_v41  ;;  %v331_v16 = vld [vmem:[%s2855_s1 + $0x4e8] sm:$0xff]  ;;  %v282_v23 = vld [vmem:[%s2855_s1 + $0x360] sm:$0xff]  ;;  %v300_v28 = vld [vmem:[%s2855_s1 + $0x3f0] sm:$0xff] }
  0x43   :  { %695 = vmatprep.mubr.f32.mxu0 %v19_v59  ;;  %1633 = vmatprep.subr.bf16.mxu0 %v1632_v56  ;;  %v279_v56 = vld [vmem:[%s2855_s1 + $0x348] sm:$0xff]  ;;  %v314_v25 = vld [vmem:[%s2855_s1 + $0x460] sm:$0xff]  ;;  %v301_v29 = vld [vmem:[%s2855_s1 + $0x3f8] sm:$0xff] }
  0x44   :  { %551 = vmatmul.mubr.f32.vlgmr.msra.gmra.mrb[16].mxu1 %v16_v62  ;;  %v311_v59 = vld [vmem:[%s2855_s1 + $0x448] sm:$0xff]  ;;  %v56_v62 = vld [vmem:[%s2856_s0 + $0x150] sm:$0xff]  ;;  %v333_v32 = vld [vmem:[%s2855_s1 + $0x4f8] sm:$0xff] }
  0x45   :  { %1603 = vmatpush3.bf16.msra.mxu1 %v1602_v63  ;;  %696 = vmatmul.mubr.f32.vlgmr.msra.gmra.mrb[16].mxu0 %v18_v2  ;;  %v328_v63 = vld [vmem:[%s2855_s1 + $0x4d0] sm:$0xff]  ;;  %v67_v2 = vld [vmem:[%s2856_s0 + $0x1a8] sm:$0xff]  ;;  %v285_v40 = vld [vmem:[%s2855_s1 + $0x378] sm:$0xff] }
  0x46   :  { %555 = vmatprep.mubr.f32.mxu1 %v27_v3  ;;  %1635 = vmatpush3.bf16.msra.mxu0 %v1634_v4  ;;  %v69_v3 = vld [vmem:[%s2856_s0 + $0x1b8] sm:$0xff]  ;;  %v1618_v4 = vpack.c.bf16 %v279_v56, %v278_v55  ;;  %v283_v24 = vld [vmem:[%s2855_s1 + $0x368] sm:$0xff]  ;;  %v332_v31 = vld [vmem:[%s2855_s1 + $0x4f0] sm:$0xff] }
  0x47   :  { %700 = vmatprep.mubr.f32.mxu0 %v29_v5  ;;  %1605 = vmatprep.subr.bf16.mxu1 %v1604_v6  ;;  %v1650_v5 = vpack.c.bf16 %v311_v59, %v310_v57  ;;  %v1620_v6 = vpack.c.bf16 %v297_v61, %v296_v60  ;;  %v315_v27 = vld [vmem:[%s2855_s1 + $0x468] sm:$0xff]  ;;  %v284_v39 = vld [vmem:[%s2855_s1 + $0x370] sm:$0xff]  ;;  %v1660_v41 = vpack.c.bf16 %v333_v32, %v332_v31  ;;  %v317_v43 = vld [vmem:[%s2855_s1 + $0x478] sm:$0xff] }
  0x48   :  { %556 = vmatmul.mubr.f32.gmra.mrb[18].mxu1 %v26_v14  ;;  %1637 = vmatprep.subr.bf16.mxu0 %v1636_v10  ;;  %v1652_v10 = vpack.c.bf16 %v329_v0, %v328_v63  ;;  %v66_v14 = vld [vmem:[%s2856_s0 + $0x1a0] sm:$0xff]  ;;  %v88_v45 = vld [vmem:[%s2856_s0 + $0x250] sm:$0xff]  ;;  %v1630_v47 = vpack.c.bf16 %v285_v40, %v284_v39  ;;  %v99_v48 = vld [vmem:[%s2856_s0 + $0x2a8] sm:$0xff] }
  0x49   :  { %701 = vmatmul.mubr.f32.gmra.mrb[18].mxu0 %v28_v17  ;;  %560 = vmatprep.mubr.f32.mxu1 %v37_v18  ;;  %v68_v17 = vld [vmem:[%s2856_s0 + $0x1b0] sm:$0xff]  ;;  %v77_v18 = vld [vmem:[%s2856_s0 + $0x1f8] sm:$0xff]  ;;  %v86_v44 = vld [vmem:[%s2856_s0 + $0x240] sm:$0xff] }
  0x4a   :  { %705 = vmatprep.mubr.f32.mxu0 %v39_v19  ;;  %1607 = vmatpush3.bf16.msra.mxu1 %v1606_v20  ;;  %v79_v19 = vld [vmem:[%s2856_s0 + $0x208] sm:$0xff]  ;;  %v1622_v20 = vpack.c.bf16 %v281_v8, %v280_v7  ;;  %v108_v55 = vld [vmem:[%s2856_s0 + $0x2f0] sm:$0xff]  ;;  %v117_v56 = vld [vmem:[%s2856_s0 + $0x338] sm:$0xff] }
  0x4b   :  { %1639 = vmatpush3.bf16.msra.mxu0 %v1638_v21  ;;  %1609 = vmatprep.subr.bf16.mxu1 %v1608_v22  ;;  %v1654_v21 = vpack.c.bf16 %v313_v11, %v312_v9  ;;  %v1624_v22 = vpack.c.bf16 %v299_v13, %v298_v12  ;;  %v119_v57 = vld [vmem:[%s2856_s0 + $0x348] sm:$0xff]  ;;  %v118_v59 = vld [vmem:[%s2856_s0 + $0x340] sm:$0xff]  ;;  %v129_v61 = vld [vmem:[%s2856_s0 + $0x398] sm:$0xff] }
  0x4c   :  { %561 = vmatmul.mubr.f32.gmra.mrb[20].mxu1 %v36_v30  ;;  %1641 = vmatprep.subr.bf16.mxu0 %v1640_v26  ;;  %v1656_v26 = vpack.c.bf16 %v331_v16, %v330_v15  ;;  %v76_v30 = vld [vmem:[%s2856_s0 + $0x1f0] sm:$0xff]  ;;  %v127_v60 = vld [vmem:[%s2856_s0 + $0x388] sm:$0xff]  ;;  %v137_v0 = vld [vmem:[%s2856_s0 + $0x3d8] sm:$0xff] }
  0x4d   :  { %706 = vmatmul.mubr.f32.gmra.mrb[20].mxu0 %v38_v33  ;;  %565 = vmatprep.mubr.f32.mxu1 %v47_v34  ;;  %v78_v33 = vld [vmem:[%s2856_s0 + $0x200] sm:$0xff]  ;;  %v87_v34 = vld [vmem:[%s2856_s0 + $0x248] sm:$0xff]  ;;  %v128_v63 = vld [vmem:[%s2856_s0 + $0x390] sm:$0xff] }
  0x4e   :  { %710 = vmatprep.mubr.f32.mxu0 %v49_v35  ;;  %1611 = vmatpush3.bf16.msra.mxu1 %v1610_v36  ;;  %v1626_v35 = vpack.c.bf16 %v283_v24, %v282_v23  ;;  %v89_v36 = vld [vmem:[%s2856_s0 + $0x258] sm:$0xff]  ;;  %v148_v7 = vld [vmem:[%s2856_s0 + $0x430] sm:$0xff]  ;;  %v159_v9 = vld [vmem:[%s2856_s0 + $0x488] sm:$0xff] }
  0x4f   :  { %1643 = vmatpush3.bf16.msra.mxu0 %v1642_v37  ;;  %1613 = vmatprep.subr.bf16.mxu1 %v1612_v38  ;;  %v1658_v37 = vpack.c.bf16 %v315_v27, %v314_v25  ;;  %v1628_v38 = vpack.c.bf16 %v301_v29, %v300_v28  ;;  %v157_v8 = vld [vmem:[%s2856_s0 + $0x478] sm:$0xff]  ;;  %v158_v11 = vld [vmem:[%s2856_s0 + $0x480] sm:$0xff]  ;;  %v167_v12 = vld [vmem:[%s2856_s0 + $0x4c8] sm:$0xff] }
  0x50   :  { %566 = vmatmul.mubr.f32.gmra.mrb[22].mxu1 %v46_v46  ;;  %1645 = vmatprep.subr.bf16.mxu0 %v1644_v42  ;;  %v316_v42 = vld [vmem:[%s2855_s1 + $0x470] sm:$0xff]  ;;  %v97_v46 = vld [vmem:[%s2856_s0 + $0x298] sm:$0xff]  ;;  %v43_v25 = vld [vmem:[%s2856_s0 + $0xe8] sm:$0xff] }
  0x51   :  { %711 = vmatmul.mubr.f32.gmra.mrb[22].mxu0 %v48_v49  ;;  %570 = vmatprep.mubr.f32.mxu1 %v57_v50  ;;  %v1662_v49 = vpack.c.bf16 %v317_v43, %v316_v42  ;;  %v96_v50 = vld [vmem:[%s2856_s0 + $0x290] sm:$0xff]  ;;  %v169_v13 = vld [vmem:[%s2856_s0 + $0x4d8] sm:$0xff]  ;;  %v42_v27 = vld [vmem:[%s2856_s0 + $0xe0] sm:$0xff] }
  0x52   :  { %715 = vmatprep.mubr.f32.mxu0 %v59_v51  ;;  %1615 = vmatpush3.bf16.msra.mxu1 %v1614_v52  ;;  %v98_v51 = vld [vmem:[%s2856_s0 + $0x2a0] sm:$0xff]  ;;  %v107_v52 = vld [vmem:[%s2856_s0 + $0x2e8] sm:$0xff]  ;;  %v168_v15 = vld [vmem:[%s2856_s0 + $0x4d0] sm:$0xff] }
  0x53   :  { %1647 = vmatpush3.bf16.msra.mxu0 %v1646_v53  ;;  %1617 = vmatprep.subr.bf16.mxu1 %v1616_v54  ;;  %v109_v53 = vld [vmem:[%s2856_s0 + $0x2f8] sm:$0xff]  ;;  %v106_v54 = vld [vmem:[%s2856_s0 + $0x2e0] sm:$0xff]  ;;  %v32_v23 = vld [vmem:[%s2856_s0 + $0x90] sm:$0xff] }
  0x54   :  { %571 = vmatmul.mubr.f32.gmra.mrb[24].mxu1 %v56_v62  ;;  %1649 = vmatprep.subr.bf16.mxu0 %v1648_v58  ;;  %v116_v58 = vld [vmem:[%s2856_s0 + $0x330] sm:$0xff]  ;;  %v126_v62 = vld [vmem:[%s2856_s0 + $0x380] sm:$0xff]  ;;  %v21_v16 = vld [vmem:[%s2856_s0 + $0x38] sm:$0xff] }
  0x55   :  { %716 = vmatmul.mubr.f32.gmra.mrb[24].mxu0 %v58_v1  ;;  %575 = vmatprep.mubr.f32.mxu1 %v67_v2  ;;  %v139_v1 = vld [vmem:[%s2856_s0 + $0x3e8] sm:$0xff]  ;;  %v136_v2 = vld [vmem:[%s2856_s0 + $0x3d0] sm:$0xff]  ;;  %v41_v24 = vld [vmem:[%s2856_s0 + $0xd8] sm:$0xff] }
  0x56   :  { %720 = vmatprep.mubr.f32.mxu0 %v69_v3  ;;  %1619 = vmatpush3.bf16.msra.mxu1 %v1618_v4  ;;  %v138_v3 = vld [vmem:[%s2856_s0 + $0x3e0] sm:$0xff]  ;;  %v147_v4 = vld [vmem:[%s2856_s0 + $0x428] sm:$0xff]  ;;  %v53_v29 = vld [vmem:[%s2856_s0 + $0x138] sm:$0xff] }
  0x57   :  { %1651 = vmatpush3.bf16.msra.mxu0 %v1650_v5  ;;  %1621 = vmatprep.subr.bf16.mxu1 %v1620_v6  ;;  %v149_v5 = vld [vmem:[%s2856_s0 + $0x438] sm:$0xff]  ;;  %v146_v6 = vld [vmem:[%s2856_s0 + $0x420] sm:$0xff]  ;;  %v51_v28 = vld [vmem:[%s2856_s0 + $0x128] sm:$0xff] }
  0x58   :  { %576 = vmatmul.mubr.f32.gmra.mrb[26].mxu1 %v66_v14  ;;  %1653 = vmatprep.subr.bf16.mxu0 %v1652_v10  ;;  %v156_v10 = vld [vmem:[%s2856_s0 + $0x470] sm:$0xff]  ;;  %v166_v14 = vld [vmem:[%s2856_s0 + $0x4c0] sm:$0xff]  ;;  %v61_v32 = vld [vmem:[%s2856_s0 + $0x178] sm:$0xff] }
  0x59   :  { %721 = vmatmul.mubr.f32.gmra.mrb[26].mxu0 %v68_v17  ;;  %580 = vmatprep.mubr.f32.mxu1 %v77_v18  ;;  %v23_v17 = vld [vmem:[%s2856_s0 + $0x48] sm:$0xff]  ;;  %v20_v18 = vld [vmem:[%s2856_s0 + $0x30] sm:$0xff]  ;;  %v81_v40 = vld [vmem:[%s2856_s0 + $0x218] sm:$0xff] }
  0x5a   :  { %725 = vmatprep.mubr.f32.mxu0 %v79_v19  ;;  %1623 = vmatpush3.bf16.msra.mxu1 %v1622_v20  ;;  %v22_v19 = vld [vmem:[%s2856_s0 + $0x40] sm:$0xff]  ;;  %v31_v20 = vld [vmem:[%s2856_s0 + $0x88] sm:$0xff]  ;;  %v52_v31 = vld [vmem:[%s2856_s0 + $0x130] sm:$0xff] }
  0x5b   :  { %1655 = vmatpush3.bf16.msra.mxu0 %v1654_v21  ;;  %1625 = vmatprep.subr.bf16.mxu1 %v1624_v22  ;;  %v33_v21 = vld [vmem:[%s2856_s0 + $0x98] sm:$0xff]  ;;  %v30_v22 = vld [vmem:[%s2856_s0 + $0x80] sm:$0xff]  ;;  %v72_v39 = vld [vmem:[%s2856_s0 + $0x1d0] sm:$0xff] }
  0x5c   :  { %581 = vmatmul.mubr.f32.gmra.mrb[28].mxu1 %v76_v30  ;;  %1657 = vmatprep.subr.bf16.mxu0 %v1656_v26  ;;  %v40_v26 = vld [vmem:[%s2856_s0 + $0xd0] sm:$0xff]  ;;  %v50_v30 = vld [vmem:[%s2856_s0 + $0x120] sm:$0xff] }
  0x5d   :  { %726 = vmatmul.mubr.f32.gmra.mrb[28].mxu0 %v78_v33  ;;  %585 = vmatprep.mubr.f32.mxu1 %v87_v34  ;;  %v63_v33 = vld [vmem:[%s2856_s0 + $0x188] sm:$0xff]  ;;  %v60_v34 = vld [vmem:[%s2856_s0 + $0x170] sm:$0xff]  ;;  %v82_v43 = vld [vmem:[%s2856_s0 + $0x220] sm:$0xff] }
  0x5e   :  { %730 = vmatprep.mubr.f32.mxu0 %v89_v36  ;;  %1627 = vmatpush3.bf16.msra.mxu1 %v1626_v35  ;;  %v62_v35 = vld [vmem:[%s2856_s0 + $0x180] sm:$0xff]  ;;  %v71_v36 = vld [vmem:[%s2856_s0 + $0x1c8] sm:$0xff]  ;;  %v80_v42 = vld [vmem:[%s2856_s0 + $0x210] sm:$0xff] }
  0x5f   :  { %1659 = vmatpush3.bf16.msra.mxu0 %v1658_v37  ;;  %1629 = vmatprep.subr.bf16.mxu1 %v1628_v38  ;;  %v73_v37 = vld [vmem:[%s2856_s0 + $0x1d8] sm:$0xff]  ;;  %v70_v38 = vld [vmem:[%s2856_s0 + $0x1c0] sm:$0xff] }
  0x60   :  { %586 = vmatmul.mubr.f32.gmra.mrb[30].mxu1 %v86_v44  ;;  %1661 = vmatprep.subr.bf16.mxu0 %v1660_v41  ;;  %v83_v41 = vld [vmem:[%s2856_s0 + $0x228] sm:$0xff] }
  0x61   :  { %731 = vmatmul.mubr.f32.gmra.mrb[30].mxu0 %v88_v45  ;;  %590 = vmatprep.mubr.f32.mxu1 %v97_v46  ;;  %v91_v44 = vld [vmem:[%s2856_s0 + $0x268] sm:$0xff]  ;;  %v93_v45 = vld [vmem:[%s2856_s0 + $0x278] sm:$0xff]  ;;  %v90_v46 = vld [vmem:[%s2856_s0 + $0x260] sm:$0xff] }
  0x62   :  { %735 = vmatprep.mubr.f32.mxu0 %v99_v48  ;;  %1631 = vmatpush3.bf16.msra.mxu1 %v1630_v47  ;;  %v92_v47 = vld [vmem:[%s2856_s0 + $0x270] sm:$0xff]  ;;  %v101_v48 = vld [vmem:[%s2856_s0 + $0x2b8] sm:$0xff] }
  0x63   :  { %1663 = vmatpush3.bf16.msra.mxu0 %v1662_v49  ;;  %v103_v49 = vld [vmem:[%s2856_s0 + $0x2c8] sm:$0xff] }
  0x64   :  { %591 = vmatmul.mubr.f32.gmra.mrb[32].mxu1 %v96_v50  ;;  %v100_v50 = vld [vmem:[%s2856_s0 + $0x2b0] sm:$0xff] }
  0x65   :  { %736 = vmatmul.mubr.f32.gmra.mrb[32].mxu0 %v98_v51  ;;  %595 = vmatprep.mubr.f32.mxu1 %v107_v52  ;;  %v102_v51 = vld [vmem:[%s2856_s0 + $0x2c0] sm:$0xff]  ;;  %v111_v52 = vld [vmem:[%s2856_s0 + $0x308] sm:$0xff] }
  0x66   :  { %740 = vmatprep.mubr.f32.mxu0 %v109_v53  ;;  %v113_v53 = vld [vmem:[%s2856_s0 + $0x318] sm:$0xff] }
  0x68   :  { %596 = vmatmul.mubr.f32.gmra.mrb[34].mxu1 %v106_v54  ;;  %v110_v54 = vld [vmem:[%s2856_s0 + $0x300] sm:$0xff] }
  0x69   :  { %741 = vmatmul.mubr.f32.gmra.mrb[34].mxu0 %v108_v55  ;;  %600 = vmatprep.mubr.f32.mxu1 %v117_v56  ;;  %v112_v55 = vld [vmem:[%s2856_s0 + $0x310] sm:$0xff]  ;;  %v121_v56 = vld [vmem:[%s2856_s0 + $0x358] sm:$0xff] }
  0x6a   :  { %745 = vmatprep.mubr.f32.mxu0 %v119_v57  ;;  %v123_v57 = vld [vmem:[%s2856_s0 + $0x368] sm:$0xff] }
  0x6c   :  { %601 = vmatmul.mubr.f32.gmra.mrb[36].mxu1 %v116_v58  ;;  %v120_v58 = vld [vmem:[%s2856_s0 + $0x350] sm:$0xff] }
  0x6d   :  { %746 = vmatmul.mubr.f32.gmra.mrb[36].mxu0 %v118_v59  ;;  %605 = vmatprep.mubr.f32.mxu1 %v127_v60  ;;  %v122_v59 = vld [vmem:[%s2856_s0 + $0x360] sm:$0xff]  ;;  %v131_v60 = vld [vmem:[%s2856_s0 + $0x3a8] sm:$0xff] }
  0x6e   :  { %750 = vmatprep.mubr.f32.mxu0 %v129_v61  ;;  %v133_v61 = vld [vmem:[%s2856_s0 + $0x3b8] sm:$0xff] }
  0x70   :  { %606 = vmatmul.mubr.f32.gmra.mrb[38].mxu1 %v126_v62  ;;  %v130_v62 = vld [vmem:[%s2856_s0 + $0x3a0] sm:$0xff] }
  0x71   :  { %751 = vmatmul.mubr.f32.gmra.mrb[38].mxu0 %v128_v63  ;;  %610 = vmatprep.mubr.f32.mxu1 %v137_v0  ;;  %v132_v63 = vld [vmem:[%s2856_s0 + $0x3b0] sm:$0xff]  ;;  %v141_v0 = vld [vmem:[%s2856_s0 + $0x3f8] sm:$0xff] }
  0x72   :  { %755 = vmatprep.mubr.f32.mxu0 %v139_v1  ;;  %v143_v1 = vld [vmem:[%s2856_s0 + $0x408] sm:$0xff] }
  0x74   :  { %611 = vmatmul.mubr.f32.gmra.mrb[40].mxu1 %v136_v2  ;;  %v140_v2 = vld [vmem:[%s2856_s0 + $0x3f0] sm:$0xff] }
  0x75   :  { %756 = vmatmul.mubr.f32.gmra.mrb[40].mxu0 %v138_v3  ;;  %615 = vmatprep.mubr.f32.mxu1 %v147_v4  ;;  %v142_v3 = vld [vmem:[%s2856_s0 + $0x400] sm:$0xff]  ;;  %v151_v4 = vld [vmem:[%s2856_s0 + $0x448] sm:$0xff] }
  0x76   :  { %760 = vmatprep.mubr.f32.mxu0 %v149_v5  ;;  %v153_v5 = vld [vmem:[%s2856_s0 + $0x458] sm:$0xff] }
  0x78   :  { %616 = vmatmul.mubr.f32.gmra.mrb[42].mxu1 %v146_v6  ;;  %v150_v6 = vld [vmem:[%s2856_s0 + $0x440] sm:$0xff] }
  0x79   :  { %761 = vmatmul.mubr.f32.gmra.mrb[42].mxu0 %v148_v7  ;;  %620 = vmatprep.mubr.f32.mxu1 %v157_v8  ;;  %v152_v7 = vld [vmem:[%s2856_s0 + $0x450] sm:$0xff]  ;;  %v161_v8 = vld [vmem:[%s2856_s0 + $0x498] sm:$0xff] }
  0x7a   :  { %765 = vmatprep.mubr.f32.mxu0 %v159_v9  ;;  %v163_v9 = vld [vmem:[%s2856_s0 + $0x4a8] sm:$0xff] }
  0x7c   :  { %621 = vmatmul.mubr.f32.gmra.mrb[44].mxu1 %v156_v10  ;;  %v160_v10 = vld [vmem:[%s2856_s0 + $0x490] sm:$0xff] }
  0x7d   :  { %766 = vmatmul.mubr.f32.gmra.mrb[44].mxu0 %v158_v11  ;;  %625 = vmatprep.mubr.f32.mxu1 %v167_v12  ;;  %v162_v11 = vld [vmem:[%s2856_s0 + $0x4a0] sm:$0xff]  ;;  %v171_v12 = vld [vmem:[%s2856_s0 + $0x4e8] sm:$0xff] }
  0x7e   :  { %770 = vmatprep.mubr.f32.mxu0 %v169_v13  ;;  %v173_v13 = vld [vmem:[%s2856_s0 + $0x4f8] sm:$0xff] }
  0x80   :  { %626 = vmatmul.mubr.f32.gmra.mrb[46].mxu1 %v166_v14  ;;  %v170_v14 = vld [vmem:[%s2856_s0 + $0x4e0] sm:$0xff] }
  0x81   :  { %771 = vmatmul.mubr.f32.gmra.mrb[46].mxu0 %v168_v15  ;;  %840 = vmatprep.mubr.f32.mxu1 %v21_v16  ;;  %v172_v15 = vld [vmem:[%s2856_s0 + $0x4f0] sm:$0xff] }
  0x82   :  { %985 = vmatprep.mubr.f32.mxu0 %v23_v17 }
  0x84   :  { %841 = vmatmul.mubr.f32.vlgmr.msra.gmra.mrb[48].mxu1 %v20_v18 }
  0x85   :  { %986 = vmatmul.mubr.f32.vlgmr.msra.gmra.mrb[48].mxu0 %v22_v19  ;;  %845 = vmatprep.mubr.f32.mxu1 %v31_v20 }
  0x86   :  { %990 = vmatprep.mubr.f32.mxu0 %v33_v21 }
  0x88   :  { %846 = vmatmul.mubr.f32.gmra.mrb[50].mxu1 %v30_v22 }
  0x89   :  { %991 = vmatmul.mubr.f32.gmra.mrb[50].mxu0 %v32_v23  ;;  %850 = vmatprep.mubr.f32.mxu1 %v41_v24 }
  0x8a   :  { %995 = vmatprep.mubr.f32.mxu0 %v43_v25 }
  0x8c   :  { %851 = vmatmul.mubr.f32.gmra.mrb[52].mxu1 %v40_v26 }
  0x8d   :  { %996 = vmatmul.mubr.f32.gmra.mrb[52].mxu0 %v42_v27  ;;  %855 = vmatprep.mubr.f32.mxu1 %v51_v28 }
  0x8e   :  { %1000 = vmatprep.mubr.f32.mxu0 %v53_v29 }
  0x90   :  { %856 = vmatmul.mubr.f32.gmra.mrb[54].mxu1 %v50_v30 }
  0x91   :  { %1001 = vmatmul.mubr.f32.gmra.mrb[54].mxu0 %v52_v31  ;;  %860 = vmatprep.mubr.f32.mxu1 %v61_v32 }
  0x92   :  { %1005 = vmatprep.mubr.f32.mxu0 %v63_v33 }
  0x94   :  { %861 = vmatmul.mubr.f32.gmra.mrb[56].mxu1 %v60_v34 }
  0x95   :  { %1006 = vmatmul.mubr.f32.gmra.mrb[56].mxu0 %v62_v35  ;;  %865 = vmatprep.mubr.f32.mxu1 %v71_v36 }
  0x96   :  { %1010 = vmatprep.mubr.f32.mxu0 %v73_v37 }
  0x98   :  { %866 = vmatmul.mubr.f32.gmra.mrb[58].mxu1 %v70_v38 }
  0x99   :  { %1011 = vmatmul.mubr.f32.gmra.mrb[58].mxu0 %v72_v39  ;;  %870 = vmatprep.mubr.f32.mxu1 %v81_v40 }
  0x9a   :  { %1015 = vmatprep.mubr.f32.mxu0 %v83_v41 }
  0x9c   :  { %871 = vmatmul.mubr.f32.gmra.mrb[60].mxu1 %v80_v42 }
  0x9d   :  { %1016 = vmatmul.mubr.f32.gmra.mrb[60].mxu0 %v82_v43  ;;  %875 = vmatprep.mubr.f32.mxu1 %v91_v44 }
  0x9e   :  { %1020 = vmatprep.mubr.f32.mxu0 %v93_v45 }
  0xa0   :  { %876 = vmatmul.mubr.f32.gmra.mrb[62].mxu1 %v90_v46 }
  0xa1   :  { %1021 = vmatmul.mubr.f32.gmra.mrb[62].mxu0 %v92_v47  ;;  %880 = vmatprep.mubr.f32.mxu1 %v101_v48 }
  0xa2   :  { %1025 = vmatprep.mubr.f32.mxu0 %v103_v49 }
  0xa4   :  { %881 = vmatmul.mubr.f32.gmra.mrb[64].mxu1 %v100_v50 }
  0xa5   :  { %1026 = vmatmul.mubr.f32.gmra.mrb[64].mxu0 %v102_v51  ;;  %885 = vmatprep.mubr.f32.mxu1 %v111_v52 }
  0xa6   :  { %1030 = vmatprep.mubr.f32.mxu0 %v113_v53 }
  0xa8   :  { %886 = vmatmul.mubr.f32.gmra.mrb[66].mxu1 %v110_v54 }
  0xa9   :  { %1031 = vmatmul.mubr.f32.gmra.mrb[66].mxu0 %v112_v55  ;;  %890 = vmatprep.mubr.f32.mxu1 %v121_v56 }
  0xaa   :  { %1035 = vmatprep.mubr.f32.mxu0 %v123_v57 }
  0xac   :  { %891 = vmatmul.mubr.f32.gmra.mrb[68].mxu1 %v120_v58 }
  0xad   :  { %1036 = vmatmul.mubr.f32.gmra.mrb[68].mxu0 %v122_v59  ;;  %895 = vmatprep.mubr.f32.mxu1 %v131_v60 }
  0xae   :  { %1040 = vmatprep.mubr.f32.mxu0 %v133_v61 }
  0xb0   :  { %896 = vmatmul.mubr.f32.gmra.mrb[70].mxu1 %v130_v62 }
  0xb1   :  { %1041 = vmatmul.mubr.f32.gmra.mrb[70].mxu0 %v132_v63  ;;  %900 = vmatprep.mubr.f32.mxu1 %v141_v0  ;;  %v2715_v0 = vld [vmem:[%s2857_s2] ss:$0 sm:$0xff] }
  0xb2   :  { %1045 = vmatprep.mubr.f32.mxu0 %v143_v1 }
  0xb4   :  { %901 = vmatmul.mubr.f32.gmra.mrb[72].mxu1 %v140_v2 }
  0xb5   :  { %1046 = vmatmul.mubr.f32.gmra.mrb[72].mxu0 %v142_v3  ;;  %905 = vmatprep.mubr.f32.mxu1 %v151_v4 }
  0xb6   :  { %1050 = vmatprep.mubr.f32.mxu0 %v153_v5 }
  0xb8   :  { %906 = vmatmul.mubr.f32.gmra.mrb[74].mxu1 %v150_v6 }
  0xb9   :  { %1051 = vmatmul.mubr.f32.gmra.mrb[74].mxu0 %v152_v7  ;;  %910 = vmatprep.mubr.f32.mxu1 %v161_v8 }
  0xba   :  { %1055 = vmatprep.mubr.f32.mxu0 %v163_v9 }
  0xbc   :  { %911 = vmatmul.mubr.f32.gmra.mrb[76].mxu1 %v160_v10 }
  0xbd   :  { %1056 = vmatmul.mubr.f32.gmra.mrb[76].mxu0 %v162_v11  ;;  %915 = vmatprep.mubr.f32.mxu1 %v171_v12 }
  0xbe   :  { %1060 = vmatprep.mubr.f32.mxu0 %v173_v13 }
  0xc0   :  { %916 = vmatmul.mubr.f32.gmra.mrb[78].mxu1 %v170_v14 }
  0xc1   :  { %1061 = vmatmul.mubr.f32.gmra.mrb[78].mxu0 %v172_v15 }
  0xf7   :  { %v1160_v16 = vpop.f32.mrb[0].mxu1  ;;  %v1136_v17 = vpop.f32.mrb[0].mxu0 }
  0xf8   :  { %v1161_v18 = vpop.f32.mrb[1].mxu1  ;;  %v1137_v19 = vpop.f32.mrb[1].mxu0 }
  0xf9   :  { %v2692_v20 = vadd.f32 %v1161_v18, %v1160_v16  ;;  %v1138_v21 = vadd.f32 %v1137_v19, %v1136_v17 }
  0xfb   :  { %v1163_v22 = vpop.f32.mrb[2].mxu1  ;;  %v1139_v23 = vpop.f32.mrb[2].mxu0  ;;  %v408_v4 = vadd.f32 %v1138_v21, %v2715_v0 }
  0xfc   :  { %v1164_v24 = vpop.f32.mrb[3].mxu1  ;;  %v1140_v25 = vpop.f32.mrb[3].mxu0 }
  0xfd   :  { %v2694_v26 = vadd.f32 %v1164_v24, %v1163_v22  ;;  %v1141_v27 = vadd.f32 %v1140_v25, %v1139_v23 }
  0xff   :  { %v1166_v28 = vpop.f32.mrb[4].mxu1  ;;  %v1142_v29 = vpop.f32.mrb[4].mxu0  ;;  %v413_v12 = vadd.f32 %v1141_v27, %v2715_v0 }
 0x100   :  { %v1167_v30 = vpop.f32.mrb[5].mxu1  ;;  %v1143_v31 = vpop.f32.mrb[5].mxu0 }
 0x101   :  { %v2696_v32 = vadd.f32 %v1167_v30, %v1166_v28  ;;  %v1144_v33 = vadd.f32 %v1143_v31, %v1142_v29 }
 0x103   :  { %v1169_v34 = vpop.f32.mrb[6].mxu1  ;;  %v1145_v35 = vpop.f32.mrb[6].mxu0  ;;  %v418_v21 = vadd.f32 %v1144_v33, %v2715_v0 }
 0x104   :  { %v1170_v36 = vpop.f32.mrb[7].mxu1  ;;  %v1146_v37 = vpop.f32.mrb[7].mxu0 }
 0x105   :  { %v2698_v38 = vadd.f32 %v1170_v36, %v1169_v34  ;;  %v1147_v39 = vadd.f32 %v1146_v37, %v1145_v35 }
 0x107   :  { %v1172_v40 = vpop.f32.mrb[8].mxu1  ;;  %v1148_v41 = vpop.f32.mrb[8].mxu0  ;;  %v423_v34 = vadd.f32 %v1147_v39, %v2715_v0 }
 0x108   :  { %v1173_v42 = vpop.f32.mrb[9].mxu1  ;;  %v1149_v43 = vpop.f32.mrb[9].mxu0 }
 0x109   :  { %v2700_v44 = vadd.f32 %v1173_v42, %v1172_v40  ;;  %v1150_v45 = vadd.f32 %v1149_v43, %v1148_v41 }
 0x10b   :  { %v1175_v46 = vpop.f32.mrb[10].mxu1  ;;  %v1151_v47 = vpop.f32.mrb[10].mxu0 }
 0x10c   :  { %v1176_v48 = vpop.f32.mrb[11].mxu1  ;;  %v1152_v49 = vpop.f32.mrb[11].mxu0 }
 0x10d   :  { %v2702_v50 = vadd.f32 %v1176_v48, %v1175_v46  ;;  %v1153_v51 = vadd.f32 %v1152_v49, %v1151_v47  ;;  %v428_v46 = vadd.f32 %v1150_v45, %v2715_v0 }
 0x10f   :  { %v1178_v52 = vpop.f32.mrb[12].mxu1  ;;  %v1154_v53 = vpop.f32.mrb[12].mxu0 }
 0x110   :  { %v1179_v54 = vpop.f32.mrb[13].mxu1  ;;  %v1155_v55 = vpop.f32.mrb[13].mxu0 }
 0x111   :  { %v2704_v56 = vadd.f32 %v1179_v54, %v1178_v52  ;;  %v2706_v57 = vadd.f32 %v1155_v55, %v1154_v53 }
 0x113   :  { %v1181_v58 = vpop.f32.mrb[14].mxu1  ;;  %v1157_v59 = vpop.f32.mrb[14].mxu0 }
 0x114   :  { %v1182_v60 = vpop.f32.mrb[15].mxu1  ;;  %v1158_v61 = vpop.f32.mrb[15].mxu0 }
 0x115   :  { %v2708_v62 = vadd.f32 %v1182_v60, %v1181_v58  ;;  %v2710_v63 = vadd.f32 %v1158_v61, %v1157_v59  ;;  %v433_v58 = vadd.f32 %v1153_v51, %v2715_v0 }
 0x117   :  { %v1216_v1 = vpop.f32.mrb[16].mxu1 }
 0x118   :  { %v1217_v2 = vpop.f32.mrb[17].mxu1  ;;  %v1296_v3 = vpop.f32.mrb[16].mxu0 }
 0x119   :  { %v1218_v5 = vadd.f32 %v1217_v2, %v1216_v1  ;;  %v1297_v6 = vpop.f32.mrb[17].mxu0 }
 0x11a   :  { %v1298_v7 = vadd.f32 %v1297_v6, %v1296_v3 }
 0x11b   :  { %v553_v8 = vadd.f32 %v1218_v5, %v408_v4  ;;  %v1219_v9 = vpop.f32.mrb[18].mxu1  ;;  %v438_v5 = vadd.f32 %v2706_v57, %v2715_v0 }
 0x11c   :  { %v1220_v10 = vpop.f32.mrb[19].mxu1  ;;  %v1299_v11 = vpop.f32.mrb[18].mxu0 }
 0x11d   :  { %v2719_v13 = vadd.f32 %v1298_v7, %v553_v8  ;;  %v1221_v14 = vadd.f32 %v1220_v10, %v1219_v9  ;;  %v1300_v15 = vpop.f32.mrb[19].mxu0 }
 0x11e   :  { %v1301_v16 = vadd.f32 %v1300_v15, %v1299_v11 }
 0x11f   :  { %v558_v17 = vadd.f32 %v1221_v14, %v413_v12  ;;  %v1222_v18 = vpop.f32.mrb[20].mxu1  ;;  %v443_v14 = vadd.f32 %v2710_v63, %v2715_v0 }
 0x120   :  { %v1223_v19 = vpop.f32.mrb[21].mxu1  ;;  %v1302_v22 = vpop.f32.mrb[20].mxu0 }
 0x121   :  { %v2722_v23 = vadd.f32 %v1301_v16, %v558_v17  ;;  %v1224_v24 = vadd.f32 %v1223_v19, %v1222_v18  ;;  %v1303_v25 = vpop.f32.mrb[21].mxu0 }
 0x122   :  { %v1304_v28 = vadd.f32 %v1303_v25, %v1302_v22 }
 0x123   :  { %v563_v29 = vadd.f32 %v1224_v24, %v418_v21  ;;  %v1225_v30 = vpop.f32.mrb[22].mxu1  ;;  %v448_v24 = vadd.f32 %v2692_v20, %v2715_v0 }
 0x124   :  { %v1226_v31 = vpop.f32.mrb[23].mxu1  ;;  %v1305_v27 = vpop.f32.mrb[22].mxu0 }
 0x125   :  { %v2725_v35 = vadd.f32 %v1304_v28, %v563_v29  ;;  %v1227_v36 = vadd.f32 %v1226_v31, %v1225_v30  ;;  %v1306_v37 = vpop.f32.mrb[23].mxu0 }
 0x126   :  { %v1307_v40 = vadd.f32 %v1306_v37, %v1305_v27 }
 0x127   :  { %v568_v41 = vadd.f32 %v1227_v36, %v423_v34  ;;  %v1228_v42 = vpop.f32.mrb[24].mxu1  ;;  %v453_v36 = vadd.f32 %v2694_v26, %v2715_v0 }
 0x128   :  { %v1229_v43 = vpop.f32.mrb[25].mxu1  ;;  %v1308_v33 = vpop.f32.mrb[24].mxu0 }
 0x129   :  { %v2728_v47 = vadd.f32 %v1307_v40, %v568_v41  ;;  %v1230_v48 = vadd.f32 %v1229_v43, %v1228_v42  ;;  %v1309_v49 = vpop.f32.mrb[25].mxu0 }
 0x12a   :  { %v1310_v52 = vadd.f32 %v1309_v49, %v1308_v33 }
 0x12b   :  { %v573_v53 = vadd.f32 %v1230_v48, %v428_v46  ;;  %v1231_v54 = vpop.f32.mrb[26].mxu1  ;;  %v458_v48 = vadd.f32 %v2696_v32, %v2715_v0 }
 0x12c   :  { %v1232_v55 = vpop.f32.mrb[27].mxu1  ;;  %v1311_v39 = vpop.f32.mrb[26].mxu0 }
 0x12d   :  { %v2731_v59 = vadd.f32 %v1310_v52, %v573_v53  ;;  %v1233_v60 = vadd.f32 %v1232_v55, %v1231_v54  ;;  %v1312_v61 = vpop.f32.mrb[27].mxu0 }
 0x12e   :  { %v1313_v1 = vadd.f32 %v1312_v61, %v1311_v39 }
 0x12f   :  { %v578_v2 = vadd.f32 %v1233_v60, %v433_v58  ;;  %v1234_v3 = vpop.f32.mrb[28].mxu1  ;;  %v463_v60 = vadd.f32 %v2698_v38, %v2715_v0 }
 0x130   :  { %v1235_v4 = vpop.f32.mrb[29].mxu1  ;;  %v1314_v45 = vpop.f32.mrb[28].mxu0 }
 0x131   :  { %v2735_v6 = vadd.f32 %v1313_v1, %v578_v2  ;;  %v1236_v7 = vadd.f32 %v1235_v4, %v1234_v3  ;;  %v1315_v8 = vpop.f32.mrb[29].mxu0 }
 0x132   :  { %v1316_v9 = vadd.f32 %v1315_v8, %v1314_v45 }
 0x133   :  { %v583_v10 = vadd.f32 %v1236_v7, %v438_v5  ;;  %v1237_v11 = vpop.f32.mrb[30].mxu1  ;;  %v468_v7 = vadd.f32 %v2700_v44, %v2715_v0 }
 0x134   :  { %v1238_v51 = vpop.f32.mrb[31].mxu1  ;;  %v1317_v12 = vpop.f32.mrb[30].mxu0 }
 0x135   :  { %v2739_v15 = vadd.f32 %v1316_v9, %v583_v10  ;;  %v1239_v16 = vadd.f32 %v1238_v51, %v1237_v11  ;;  %v1318_v17 = vpop.f32.mrb[31].mxu0 }
 0x136   :  { %v1319_v18 = vadd.f32 %v1318_v17, %v1317_v12 }
 0x137   :  { %v588_v19 = vadd.f32 %v1239_v16, %v443_v14  ;;  %v1240_v22 = vpop.f32.mrb[32].mxu1  ;;  %v473_v16 = vadd.f32 %v2702_v50, %v2715_v0 }
 0x138   :  { %v1241_v57 = vpop.f32.mrb[33].mxu1  ;;  %v1320_v21 = vpop.f32.mrb[32].mxu0 }
 0x139   :  { %v2743_v25 = vadd.f32 %v1319_v18, %v588_v19  ;;  %v1242_v28 = vadd.f32 %v1241_v57, %v1240_v22  ;;  %v1321_v29 = vpop.f32.mrb[33].mxu0 }
 0x13a   :  { %v1322_v30 = vadd.f32 %v1321_v29, %v1320_v21 }
 0x13b   :  { %v593_v31 = vadd.f32 %v1242_v28, %v448_v24  ;;  %v1243_v27 = vpop.f32.mrb[34].mxu1  ;;  %v478_v28 = vadd.f32 %v2704_v56, %v2715_v0 }
 0x13c   :  { %v1244_v63 = vpop.f32.mrb[35].mxu1  ;;  %v1323_v34 = vpop.f32.mrb[34].mxu0 }
 0x13d   :  { %v2747_v37 = vadd.f32 %v1322_v30, %v593_v31  ;;  %v1245_v40 = vadd.f32 %v1244_v63, %v1243_v27  ;;  %v1324_v41 = vpop.f32.mrb[35].mxu0 }
 0x13e   :  { %v1325_v42 = vadd.f32 %v1324_v41, %v1323_v34 }
 0x13f   :  { %v598_v43 = vadd.f32 %v1245_v40, %v453_v36  ;;  %v1246_v33 = vpop.f32.mrb[36].mxu1  ;;  %v483_v40 = vadd.f32 %v2708_v62, %v2715_v0 }
 0x140   :  { %v1247_v20 = vpop.f32.mrb[37].mxu1  ;;  %v1326_v46 = vpop.f32.mrb[36].mxu0 }
 0x141   :  { %v2751_v49 = vadd.f32 %v1325_v42, %v598_v43  ;;  %v1248_v52 = vadd.f32 %v1247_v20, %v1246_v33  ;;  %v1327_v53 = vpop.f32.mrb[37].mxu0 }
 0x142   :  { %v1328_v54 = vadd.f32 %v1327_v53, %v1326_v46 }
 0x143   :  { %v603_v55 = vadd.f32 %v1248_v52, %v458_v48  ;;  %v1249_v39 = vpop.f32.mrb[38].mxu1 }
 0x144   :  { %v1250_v26 = vpop.f32.mrb[39].mxu1  ;;  %v1329_v58 = vpop.f32.mrb[38].mxu0 }
 0x145   :  { %v2755_v61 = vadd.f32 %v1328_v54, %v603_v55  ;;  %v1251_v1 = vadd.f32 %v1250_v26, %v1249_v39  ;;  %v1330_v2 = vpop.f32.mrb[39].mxu0 }
 0x146   :  { %v1331_v3 = vadd.f32 %v1330_v2, %v1329_v58 }
 0x147   :  { %v608_v4 = vadd.f32 %v1251_v1, %v463_v60  ;;  %v1252_v45 = vpop.f32.mrb[40].mxu1 }
 0x148   :  { %v1253_v32 = vpop.f32.mrb[41].mxu1  ;;  %v1332_v5 = vpop.f32.mrb[40].mxu0 }
 0x149   :  { %v2759_v8 = vadd.f32 %v1331_v3, %v608_v4  ;;  %v1254_v9 = vadd.f32 %v1253_v32, %v1252_v45  ;;  %v1333_v10 = vpop.f32.mrb[41].mxu0 }
 0x14a   :  { %v1334_v11 = vadd.f32 %v1333_v10, %v1332_v5 }
 0x14b   :  { %v613_v51 = vadd.f32 %v1254_v9, %v468_v7  ;;  %v1255_v12 = vpop.f32.mrb[42].mxu1 }
 0x14c   :  { %v1256_v38 = vpop.f32.mrb[43].mxu1  ;;  %v1335_v14 = vpop.f32.mrb[42].mxu0 }
 0x14d   :  { %v2763_v17 = vadd.f32 %v1334_v11, %v613_v51  ;;  %v1257_v18 = vadd.f32 %v1256_v38, %v1255_v12  ;;  %v1336_v19 = vpop.f32.mrb[43].mxu0 }
 0x14e   :  { %v1337_v22 = vadd.f32 %v1336_v19, %v1335_v14 }
 0x14f   :  { %v618_v57 = vadd.f32 %v1257_v18, %v473_v16  ;;  %v1258_v21 = vpop.f32.mrb[44].mxu1 }
 0x150   :  { %v1259_v44 = vpop.f32.mrb[45].mxu1  ;;  %v1338_v24 = vpop.f32.mrb[44].mxu0 }
 0x151   :  { %v2767_v29 = vadd.f32 %v1337_v22, %v618_v57  ;;  %v1260_v30 = vadd.f32 %v1259_v44, %v1258_v21  ;;  %v1339_v31 = vpop.f32.mrb[45].mxu0 }
 0x152   :  { %v1340_v27 = vadd.f32 %v1339_v31, %v1338_v24 }
 0x153   :  { %v623_v63 = vadd.f32 %v1260_v30, %v478_v28  ;;  %v1261_v34 = vpop.f32.mrb[46].mxu1 }
 0x154   :  { %v1262_v50 = vpop.f32.mrb[47].mxu1  ;;  %v1341_v36 = vpop.f32.mrb[46].mxu0 }
 0x155   :  { %v2771_v41 = vadd.f32 %v1340_v27, %v623_v63  ;;  %v1263_v42 = vadd.f32 %v1262_v50, %v1261_v34  ;;  %v1342_v43 = vpop.f32.mrb[47].mxu0 }
 0x156   :  { %v1343_v33 = vadd.f32 %v1342_v43, %v1341_v36 }
 0x157   :  { %v628_v20 = vadd.f32 %v1263_v42, %v483_v40  ;;  %v1376_v46 = vpop.f32.mrb[48].mxu1 }
 0x158   :  { %v1377_v56 = vpop.f32.mrb[49].mxu1  ;;  %v1456_v48 = vpop.f32.mrb[48].mxu0 }
 0x159   :  { %v2773_v52 = vadd.f32 %v1343_v33, %v628_v20  ;;  %v1378_v53 = vadd.f32 %v1377_v56, %v1376_v46  ;;  %v1457_v54 = vpop.f32.mrb[49].mxu0 }
 0x15a   :  { %v1458_v55 = vadd.f32 %v1457_v54, %v1456_v48 }
 0x15b   :  { %v843_v39 = vadd.f32 %v1378_v53, %v2719_v13  ;;  %v1379_v26 = vpop.f32.mrb[50].mxu1 }
 0x15c   :  { %v1380_v58 = vpop.f32.mrb[51].mxu1  ;;  %v1459_v60 = vpop.f32.mrb[50].mxu0 }
 0x15d   :  { %v988_v62 = vadd.f32 %v1458_v55, %v843_v39  ;;  %v1381_v0 = vadd.f32 %v1380_v58, %v1379_v26  ;;  %v1460_v1 = vpop.f32.mrb[51].mxu0 }
 0x15e   :  { %v1461_v2 = vadd.f32 %v1460_v1, %v1459_v60 }
 0x15f   :  { %1680 = vtanh.f32 %v988_v62  ;;  %v848_v3 = vadd.f32 %v1381_v0, %v2722_v23  ;;  %v1382_v4 = vpop.f32.mrb[52].mxu1 }
 0x160   :  { %v1383_v45 = vpop.f32.mrb[53].mxu1  ;;  %v1462_v32 = vpop.f32.mrb[52].mxu0 }
 0x161   :  { %v993_v5 = vadd.f32 %v1461_v2, %v848_v3  ;;  %v1384_v7 = vadd.f32 %v1383_v45, %v1382_v4  ;;  %v1463_v9 = vpop.f32.mrb[53].mxu0 }
 0x162   :  { %v1464_v10 = vadd.f32 %v1463_v9, %v1462_v32 }
 0x163   :  { %1682 = vtanh.f32 %v993_v5  ;;  %v853_v13 = vadd.f32 %v1384_v7, %v2725_v35  ;;  %v1385_v11 = vpop.f32.mrb[54].mxu1 }
 0x164   :  { %v1386_v51 = vpop.f32.mrb[55].mxu1  ;;  %v1465_v12 = vpop.f32.mrb[54].mxu0 }
 0x165   :  { %v998_v38 = vadd.f32 %v1464_v10, %v853_v13  ;;  %v1387_v14 = vadd.f32 %v1386_v51, %v1385_v11  ;;  %v1466_v16 = vpop.f32.mrb[55].mxu0 }
 0x166   :  { %v1467_v18 = vadd.f32 %v1466_v16, %v1465_v12 }
 0x167   :  { %1684 = vtanh.f32 %v998_v38  ;;  %v858_v23 = vadd.f32 %v1387_v14, %v2728_v47  ;;  %v1388_v19 = vpop.f32.mrb[56].mxu1 }
 0x168   :  { %v1389_v22 = vpop.f32.mrb[57].mxu1  ;;  %v1468_v57 = vpop.f32.mrb[56].mxu0 }
 0x169   :  { %v1681_v21 = vpop.eup %1680  ;;  %v1003_v44 = vadd.f32 %v1467_v18, %v858_v23  ;;  %v1390_v24 = vadd.f32 %v1389_v22, %v1388_v19  ;;  %v1469_v28 = vpop.f32.mrb[57].mxu0 }
 0x16a   :  { %1083 = vst.msk [vmem:[%s2858_s3] sm:$0xff] %vm1082_vm0, %v1681_v21  ;;  %v1470_v35 = vadd.f32 %v1469_v28, %v1468_v57 }
 0x16b   :  { %1686 = vtanh.f32 %v1003_v44  ;;  %v863_v30 = vadd.f32 %v1390_v24, %v2731_v59  ;;  %v1391_v31 = vpop.f32.mrb[58].mxu1 }
 0x16c   :  { %v1392_v27 = vpop.f32.mrb[59].mxu1  ;;  %v1471_v63 = vpop.f32.mrb[58].mxu0 }
 0x16d   :  { %v1683_v47 = vpop.eup %1682  ;;  %v1008_v34 = vadd.f32 %v1470_v35, %v863_v30  ;;  %v1393_v50 = vadd.f32 %v1392_v27, %v1391_v31  ;;  %v1472_v36 = vpop.f32.mrb[59].mxu0 }
 0x16e   :  { %1084 = vst.msk [vmem:[%s2858_s3 + $0x8] sm:$0xff] %vm1082_vm0, %v1683_v47  ;;  %v1473_v40 = vadd.f32 %v1472_v36, %v1471_v63 }
 0x16f   :  { %1688 = vtanh.f32 %v1008_v34  ;;  %v868_v42 = vadd.f32 %v1393_v50, %v2735_v6  ;;  %v1394_v43 = vpop.f32.mrb[60].mxu1 }
 0x170   :  { %v1395_v33 = vpop.f32.mrb[61].mxu1  ;;  %v1474_v20 = vpop.f32.mrb[60].mxu0 }
 0x171   :  { %v1685_v59 = vpop.eup %1684  ;;  %v1013_v46 = vadd.f32 %v1473_v40, %v868_v42  ;;  %v1396_v56 = vadd.f32 %v1395_v33, %v1394_v43  ;;  %v1475_v48 = vpop.f32.mrb[61].mxu0 }
 0x172   :  { %1085 = vst.msk [vmem:[%s2858_s3 + $0x10] sm:$0xff] %vm1082_vm0, %v1685_v59  ;;  %v1476_v53 = vadd.f32 %v1475_v48, %v1474_v20 }
 0x173   :  { %1690 = vtanh.f32 %v1013_v46  ;;  %v873_v54 = vadd.f32 %v1396_v56, %v2739_v15  ;;  %v1397_v55 = vpop.f32.mrb[62].mxu1 }
 0x174   :  { %v1398_v39 = vpop.f32.mrb[63].mxu1  ;;  %v1477_v26 = vpop.f32.mrb[62].mxu0 }
 0x175   :  { %v1687_v6 = vpop.eup %1686  ;;  %v1018_v58 = vadd.f32 %v1476_v53, %v873_v54  ;;  %v1399_v60 = vadd.f32 %v1398_v39, %v1397_v55  ;;  %v1478_v62 = vpop.f32.mrb[63].mxu0 }
 0x176   :  { %1086 = vst.msk [vmem:[%s2858_s3 + $0x18] sm:$0xff] %vm1082_vm0, %v1687_v6  ;;  %v1479_v0 = vadd.f32 %v1478_v62, %v1477_v26 }
 0x177   :  { %1692 = vtanh.f32 %v1018_v58  ;;  %v878_v1 = vadd.f32 %v1399_v60, %v2743_v25  ;;  %v1400_v2 = vpop.f32.mrb[64].mxu1 }
 0x178   :  { %v1401_v3 = vpop.f32.mrb[65].mxu1  ;;  %v1480_v4 = vpop.f32.mrb[64].mxu0 }
 0x179   :  { %v1689_v15 = vpop.eup %1688  ;;  %v1023_v45 = vadd.f32 %v1479_v0, %v878_v1  ;;  %v1402_v32 = vadd.f32 %v1401_v3, %v1400_v2  ;;  %v1481_v5 = vpop.f32.mrb[65].mxu0 }
 0x17a   :  { %1087 = vst.msk [vmem:[%s2858_s3 + $0x20] sm:$0xff] %vm1082_vm0, %v1689_v15  ;;  %v1482_v7 = vadd.f32 %v1481_v5, %v1480_v4 }
 0x17b   :  { %1694 = vtanh.f32 %v1023_v45  ;;  %v883_v9 = vadd.f32 %v1402_v32, %v2747_v37  ;;  %v1403_v10 = vpop.f32.mrb[66].mxu1 }
 0x17c   :  { %v1404_v13 = vpop.f32.mrb[67].mxu1  ;;  %v1483_v11 = vpop.f32.mrb[66].mxu0 }
 0x17d   :  { %v1691_v25 = vpop.eup %1690  ;;  %v1028_v51 = vadd.f32 %v1482_v7, %v883_v9  ;;  %v1405_v12 = vadd.f32 %v1404_v13, %v1403_v10  ;;  %v1484_v38 = vpop.f32.mrb[67].mxu0 }
 0x17e   :  { %1088 = vst.msk [vmem:[%s2858_s3 + $0x28] sm:$0xff] %vm1082_vm0, %v1691_v25  ;;  %v1485_v14 = vadd.f32 %v1484_v38, %v1483_v11 }
 0x17f   :  { %1696 = vtanh.f32 %v1028_v51  ;;  %v888_v16 = vadd.f32 %v1405_v12, %v2751_v49  ;;  %v1406_v18 = vpop.f32.mrb[68].mxu1 }
 0x180   :  { %v1407_v23 = vpop.f32.mrb[69].mxu1  ;;  %v1486_v19 = vpop.f32.mrb[68].mxu0 }
 0x181   :  { %v1693_v37 = vpop.eup %1692  ;;  %v1033_v22 = vadd.f32 %v1485_v14, %v888_v16  ;;  %v1408_v57 = vadd.f32 %v1407_v23, %v1406_v18  ;;  %v1487_v21 = vpop.f32.mrb[69].mxu0 }
 0x182   :  { %1089 = vst.msk [vmem:[%s2858_s3 + $0x30] sm:$0xff] %vm1082_vm0, %v1693_v37  ;;  %v1488_v44 = vadd.f32 %v1487_v21, %v1486_v19 }
 0x183   :  { %1698 = vtanh.f32 %v1033_v22  ;;  %v893_v24 = vadd.f32 %v1408_v57, %v2755_v61  ;;  %v1409_v28 = vpop.f32.mrb[70].mxu1 }
 0x184   :  { %v1410_v35 = vpop.f32.mrb[71].mxu1  ;;  %v1489_v30 = vpop.f32.mrb[70].mxu0 }
 0x185   :  { %v1695_v49 = vpop.eup %1694  ;;  %v1038_v31 = vadd.f32 %v1488_v44, %v893_v24  ;;  %v1411_v27 = vadd.f32 %v1410_v35, %v1409_v28  ;;  %v1490_v63 = vpop.f32.mrb[71].mxu0 }
 0x186   :  { %1090 = vst.msk [vmem:[%s2858_s3 + $0x38] sm:$0xff] %vm1082_vm0, %v1695_v49  ;;  %v1491_v47 = vadd.f32 %v1490_v63, %v1489_v30 }
 0x187   :  { %1700 = vtanh.f32 %v1038_v31  ;;  %v898_v34 = vadd.f32 %v1411_v27, %v2759_v8  ;;  %v1412_v50 = vpop.f32.mrb[72].mxu1 }
 0x188   :  { %v1413_v36 = vpop.f32.mrb[73].mxu1  ;;  %v1492_v40 = vpop.f32.mrb[72].mxu0 }
 0x189   :  { %v1697_v61 = vpop.eup %1696  ;;  %v1043_v42 = vadd.f32 %v1491_v47, %v898_v34  ;;  %v1414_v43 = vadd.f32 %v1413_v36, %v1412_v50  ;;  %v1493_v33 = vpop.f32.mrb[73].mxu0 }
 0x18a   :  { %1091 = vst.msk [vmem:[%s2858_s3 + $0x40] sm:$0xff] %vm1082_vm0, %v1697_v61  ;;  %v1494_v20 = vadd.f32 %v1493_v33, %v1492_v40 }
 0x18b   :  { %1702 = vtanh.f32 %v1043_v42  ;;  %v903_v59 = vadd.f32 %v1414_v43, %v2763_v17  ;;  %v1415_v46 = vpop.f32.mrb[74].mxu1 }
 0x18c   :  { %v1416_v56 = vpop.f32.mrb[75].mxu1  ;;  %v1495_v48 = vpop.f32.mrb[74].mxu0 }
 0x18d   :  { %v1699_v8 = vpop.eup %1698  ;;  %v1048_v53 = vadd.f32 %v1494_v20, %v903_v59  ;;  %v1417_v54 = vadd.f32 %v1416_v56, %v1415_v46  ;;  %v1496_v55 = vpop.f32.mrb[75].mxu0 }
 0x18e   :  { %1092 = vst.msk [vmem:[%s2858_s3 + $0x48] sm:$0xff] %vm1082_vm0, %v1699_v8  ;;  %v1497_v39 = vadd.f32 %v1496_v55, %v1495_v48 }
 0x18f   :  { %1704 = vtanh.f32 %v1048_v53  ;;  %v908_v26 = vadd.f32 %v1417_v54, %v2767_v29  ;;  %v1418_v6 = vpop.f32.mrb[76].mxu1 }
 0x190   :  { %v1419_v58 = vpop.f32.mrb[77].mxu1  ;;  %v1498_v60 = vpop.f32.mrb[76].mxu0 }
 0x191   :  { %v1701_v17 = vpop.eup %1700  ;;  %v1053_v62 = vadd.f32 %v1497_v39, %v908_v26  ;;  %v1420_v0 = vadd.f32 %v1419_v58, %v1418_v6  ;;  %v1499_v1 = vpop.f32.mrb[77].mxu0 }
 0x192   :  { %1093 = vst.msk [vmem:[%s2858_s3 + $0x50] sm:$0xff] %vm1082_vm0, %v1701_v17  ;;  %v1500_v2 = vadd.f32 %v1499_v1, %v1498_v60 }
 0x193   :  { %1706 = vtanh.f32 %v1053_v62  ;;  %v913_v3 = vadd.f32 %v1420_v0, %v2771_v41  ;;  %v1421_v4 = vpop.f32.mrb[78].mxu1 }
 0x194   :  { %v1422_v15 = vpop.f32.mrb[79].mxu1  ;;  %v1501_v45 = vpop.f32.mrb[78].mxu0 }
 0x195   :  { %v1703_v29 = vpop.eup %1702  ;;  %v1058_v32 = vadd.f32 %v1500_v2, %v913_v3  ;;  %v1423_v5 = vadd.f32 %v1422_v15, %v1421_v4  ;;  %v1502_v7 = vpop.f32.mrb[79].mxu0 }
 0x196   :  { %1094 = vst.msk [vmem:[%s2858_s3 + $0x58] sm:$0xff] %vm1082_vm0, %v1703_v29  ;;  %v1503_v9 = vadd.f32 %v1502_v7, %v1501_v45 }
 0x197   :  { %1708 = vtanh.f32 %v1058_v32  ;;  %v918_v10 = vadd.f32 %v1423_v5, %v2773_v52 }
 0x199   :  { %v1705_v13 = vpop.eup %1704  ;;  %v1063_v11 = vadd.f32 %v1503_v9, %v918_v10 }
 0x19a   :  { %1095 = vst.msk [vmem:[%s2858_s3 + $0x60] sm:$0xff] %vm1082_vm0, %v1705_v13 }
 0x19b   :  { %1710 = vtanh.f32 %v1063_v11 }
 0x19d   :  { %v1707_v41 = vpop.eup %1706 }
 0x19e   :  { %1096 = vst.msk [vmem:[%s2858_s3 + $0x68] sm:$0xff] %vm1082_vm0, %v1707_v41 }
 0x1a1   :  { %v1709_v25 = vpop.eup %1708 }
 0x1a2   :  { %1097 = vst.msk [vmem:[%s2858_s3 + $0x70] sm:$0xff] %vm1082_vm0, %v1709_v25 }
 0x1a5   :  { %v1711_v52 = vpop.eup %1710 }
 0x1a6   :  { %1098 = vst.msk [vmem:[%s2858_s3 + $0x78] sm:$0xff] %vm1082_vm0, %v1711_v52 }

</bundles_post_ra>
